<compile_context>
chip_gen: v6e
topology: v6e:2x2x1
jax: 0.10.0
libtpu: 0.0.40
codegen_flags: <defaults>
</compile_context>

<pallas_src>
import math
import numpy as np

import jax
import jax.numpy as jnp
from jax.experimental import pallas as pl
from jax.experimental.pallas import tpu as pltpu


# ---------------------------------------------------------------------------
# Host-side (numpy) construction of the structured angular-conv matrices.
# ---------------------------------------------------------------------------
def _structured_conv_matrix(W, an):
    """M[(oy*an+ox)*Co+co, (iy*an+ix)*Ci+ci] = W[co, ci, iy-oy+1, ix-ox+1];
    zero outside the 3x3 window / the an x an grid (== zero padding)."""
    W = np.asarray(W, dtype=np.float64)
    co_n, ci_n = W.shape[0], W.shape[1]
    M = np.zeros((an * an * co_n, an * an * ci_n), dtype=np.float64)
    for oy in range(an):
        for ox in range(an):
            ro = (oy * an + ox) * co_n
            for dy in (-1, 0, 1):
                for dx in (-1, 0, 1):
                    iy, ix = oy + dy, ox + dx
                    if 0 <= iy < an and 0 <= ix < an:
                        ci0 = (iy * an + ix) * ci_n
                        M[ro:ro + co_n, ci0:ci0 + ci_n] = W[:, :, dy + 1, dx + 1]
    return M


def _divisor_tile(P, cap):
    """Largest multiple of 128 <= cap that divides P exactly; 0 if none."""
    t = (min(cap, P) // 128) * 128
    while t >= 128:
        if P % t == 0:
            return t
        t -= 128
    return 0


def _pick_tn(P, b, cap):
    """Pixel-tile size: multiple of 128 (or full P), preferring exact divisors of P
    (unmasked full-lane stores, no ragged edge DMA); keep >= 2 total grid blocks so
    both v7x TensorCores get work."""
    cap = max(128, min(cap, P))
    tn = _divisor_tile(P, cap)
    if tn == 0:
        tn = P if P <= cap else (cap // 128) * 128   # ragged tail via cdiv + masked edge
    if b * pl.cdiv(P, tn) < 2 and P >= 256:          # v7x: don't idle one TensorCore
        tn2 = _divisor_tile(P, P // 2)
        tn = tn2 if tn2 else max(128, ((pl.cdiv(P, 2) + 127) // 128) * 128)
    return tn


# ---------------------------------------------------------------------------
# Kernel: two MXU matmuls + LeakyReLU, lane-dense (features x pixel-tile).
# ---------------------------------------------------------------------------
def upsample_kernel(x_ref, m1_ref, m2_ref, out_ref):
    m1 = m1_ref[...]                                   # (f_in,  f_in)
    m2 = m2_ref[...]                                   # (f_out, f_in)
    # In-kernel cast: no standalone host-side HBM convert pass over x.
    x = x_ref[...].astype(m1.dtype)                    # (f_in, TN) lane-dense
    prec = jax.lax.Precision.HIGHEST if m1.dtype == jnp.float32 else None

    # Stage 1: 3x3 angular conv (zero padding baked into m1) + LeakyReLU(0.1).
    y1 = jnp.dot(m1, x, preferred_element_type=jnp.float32, precision=prec)
    y1 = jnp.maximum(y1, 0.1 * y1)

    # Stage 2: 1x1 conv folded into the second 3x3 conv + LeakyReLU(0.1).
    y2 = jnp.dot(m2, y1.astype(m2.dtype), preferred_element_type=jnp.float32,
                 precision=prec)
    out_ref[...] = jnp.maximum(y2, 0.1 * y2).astype(out_ref.dtype)


def upsample_pallas(x, W1, W2, W3, an, *, tn=None, tn_cap=8192,
                    compute_dtype=jnp.bfloat16, out_dtype=None):
    """x: (b, n, c, h, w); W1: (2C,2C,3,3); W2: (C,2C,1,1); W3: (C,C,3,3)."""
    b, n, c, h, w = x.shape
    assert n == an * an
    c1 = W2.shape[0]            # channel (output channels)
    P = h * w
    f_in = n * c                # flattened (angular, 2C) features
    f_out = n * c1              # flattened (angular, C) features
    out_dtype = jnp.dtype(x.dtype if out_dtype is None else out_dtype)

    # Fold the 1x1 conv W2 into the second 3x3 conv W3 (exact: no nonlinearity in
    # between), then build the structured conv matrices on the host with numpy
    # (no chain of tiny XLA scatter updates at call time).
    Wc = np.einsum('omyx,mi->oiyx', np.asarray(W3, np.float64),
                   np.asarray(W2, np.float64)[:, :, 0, 0])
    M1 = jnp.asarray(_structured_conv_matrix(W1, an), dtype=compute_dtype)
    M2 = jnp.asarray(_structured_conv_matrix(Wc, an), dtype=compute_dtype)

    # Lane-dense layout (b, features, h*w): pure reshape — no transpose, no spatial
    # pre-padding, no host-side dtype convert (cast happens inside the kernel).
    xr = x.reshape(b, f_in, P)

    # Pixel tile.
    if tn is None:
        tn = _pick_tn(P, b, tn_cap)
    else:
        tn = min(tn, P)
        if tn < P:
            tn = max(128, (tn // 128) * 128)
    grid = (b, pl.cdiv(P, tn))

    cost = pl.CostEstimate(
        flops=2 * b * P * (f_in * f_in + f_out * f_in),
        transcendentals=0,
        bytes_accessed=b * P * (f_in * x.dtype.itemsize + f_out * out_dtype.itemsize)
        + (M1.size + M2.size) * M1.dtype.itemsize,
    )

    out = pl.pallas_call(
        upsample_kernel,
        out_shape=jax.ShapeDtypeStruct((b, f_out, P), out_dtype),
        grid_spec=pltpu.PrefetchScalarGridSpec(
            num_scalar_prefetch=0,
            grid=grid,
            in_specs=[
                pl.BlockSpec((None, f_in, tn), lambda i, j: (i, 0, j)),
                pl.BlockSpec((f_in, f_in), lambda i, j: (0, 0)),
                pl.BlockSpec((f_out, f_in), lambda i, j: (0, 0)),
            ],
            out_specs=pl.BlockSpec((None, f_out, tn), lambda i, j: (i, 0, j)),
        ),
        compiler_params=pltpu.CompilerParams(
            dimension_semantics=("parallel", "parallel"),
            vmem_limit_bytes=32 * 1024 * 1024,   # plenty: <4 MiB used even at TN=8192
        ),
        cost_estimate=cost,
    )(xr, M1, M2)

    # Feature dim already ordered (angular, C) -> pure reshape back to torch layout.
    return out.reshape(b, n, c1, h, w)


# ---------------------------------------------------------------------------
# Pure-JAX reference mirroring the PyTorch forward (for verification).
# ---------------------------------------------------------------------------
def upsample_ref(x, W1, W2, W3, an):
    b, n, c, h, w = x.shape
    N = b * h * w
    xk = jnp.transpose(x.reshape(b, n, c, h * w), (0, 3, 2, 1)).reshape(N, c, an, an)

    def conv(v, W, p):
        return jax.lax.conv_general_dilated(
            v, W, (1, 1), ((p, p), (p, p)),
            dimension_numbers=("NCHW", "OIHW", "NCHW"),
            precision=jax.lax.Precision.HIGHEST)

    def lrelu(v):
        return jnp.where(v > 0, v, 0.1 * v)

    y1 = lrelu(conv(xk, W1, 1))
    y2 = conv(y1, W2, 0)          # PixelShuffle(1) is identity
    y3 = lrelu(conv(y2, W3, 1))
    c1 = W2.shape[0]
    return jnp.transpose(
        y3.reshape(b, h * w, c1, an * an), (0, 3, 2, 1)
    ).reshape(b, an * an, c1, h, w)


if __name__ == "__main__":
    channel = 4          # module arg `channel`
    an = 2               # module arg `angular_in`
    c = 2 * channel      # angconv in_channels = channel*2
    n = an * an

    key = jax.random.PRNGKey(0)
    kx, k1, k2, k3 = jax.random.split(key, 4)
    W1 = jax.random.normal(k1, (c, c, 3, 3), dtype=jnp.float32) / math.sqrt(c * 9)
    W2 = jax.random.normal(k2, (channel, c, 1, 1), dtype=jnp.float32) / math.sqrt(c)
    W3 = jax.random.normal(k3, (channel, channel, 3, 3), dtype=jnp.float32) / math.sqrt(channel * 9)

    # Case 1: b=2, 32x32 spatial (P=1024, auto TN=1024 divides P exactly, grid (2,1)).
    b, h, w = 2, 32, 32
    x = jax.random.normal(kx, (b, n, c, h, w), dtype=jnp.float32)
    ref = upsample_ref(x, W1, W2, W3, an)

    out_f32 = jax.block_until_ready(
        upsample_pallas(x, W1, W2, W3, an, compute_dtype=jnp.float32))
    assert out_f32.shape == (b, n, channel, h, w), out_f32.shape
    assert bool(jnp.allclose(out_f32, ref, atol=1e-3, rtol=1e-3)), "f32 mismatch vs reference"

    out_bf16 = jax.block_until_ready(
        upsample_pallas(x, W1, W2, W3, an, compute_dtype=jnp.bfloat16))
    assert out_bf16.shape == (b, n, channel, h, w), out_bf16.shape
    assert bool(jnp.allclose(out_bf16, ref, atol=5e-2, rtol=5e-2)), "bf16 mismatch vs reference"

    # Case 2: ragged pixel axis (P=400, forced TN=128 -> final block uses masked
    # edge DMA/store); verifies the OOB-edge path never pollutes valid columns.
    b2, h2, w2 = 1, 20, 20
    x2 = jax.random.normal(jax.random.PRNGKey(1), (b2, n, c, h2, w2), dtype=jnp.float32)
    ref2 = upsample_ref(x2, W1, W2, W3, an)
    out2 = jax.block_until_ready(
        upsample_pallas(x2, W1, W2, W3, an, tn=128, compute_dtype=jnp.float32))
    assert out2.shape == (b2, n, channel, h2, w2), out2.shape
    assert bool(jnp.allclose(out2, ref2, atol=1e-3, rtol=1e-3)), "ragged-P mismatch vs reference"

    print("KERNEL_OK")
</pallas_src>

<mosaic_0001>
module attributes {stable_mosaic.version = 11 : i64} {
  func.func @upsample_kernel(%arg0: i32, %arg1: i32, %arg2: memref<1x32x1024xf32, #tpu.memory_space<vmem>>, %arg3: memref<32x32xf32, #tpu.memory_space<vmem>>, %arg4: memref<16x32xf32, #tpu.memory_space<vmem>>, %arg5: memref<1x16x1024xf32, #tpu.memory_space<vmem>>) attributes {dimension_semantics = [#tpu.dimension_semantics<parallel>, #tpu.dimension_semantics<parallel>], iteration_bounds = array<i64: 2, 1>, scalar_prefetch = 0 : i64, scratch_operands = 0 : i64, tpu.core_type = #tpu.core_type<tc>, window_params = [{transform_indices = @transform_0, window_bounds = array<i64: 1, 32, 1024>}, {pipeline_mode = #tpu.pipeline_mode<synchronous>, transform_indices = @transform_1, window_bounds = array<i64: 32, 32>}, {pipeline_mode = #tpu.pipeline_mode<synchronous>, transform_indices = @transform_2, window_bounds = array<i64: 16, 32>}, {transform_indices = @transform_3, window_bounds = array<i64: 1, 16, 1024>}]} {
    %c0 = arith.constant 0 : index
    %c0_0 = arith.constant 0 : index
    %0 = vector.load %arg3[%c0, %c0_0] : memref<32x32xf32, #tpu.memory_space<vmem>>, vector<32x32xf32>
    %c0_1 = arith.constant 0 : index
    %c0_2 = arith.constant 0 : index
    %1 = vector.load %arg4[%c0_1, %c0_2] : memref<16x32xf32, #tpu.memory_space<vmem>>, vector<16x32xf32>
    %c0_3 = arith.constant 0 : index
    %c0_4 = arith.constant 0 : index
    %c0_5 = arith.constant 0 : index
    %2 = vector.load %arg2[%c0_3, %c0_4, %c0_5] : memref<1x32x1024xf32, #tpu.memory_space<vmem>>, vector<1x32x1024xf32>
    %3 = vector.shape_cast %2 : vector<1x32x1024xf32> to vector<32x1024xf32>
    %cst = arith.constant dense<0.000000e+00> : vector<32x1024xf32>
    %4 = tpu.matmul %0, %3, %cst {dimension_numbers = #tpu.dot_dimension_numbers<[1], [0], [0], [1], [0, 0, 1, 1], [], []>, precision = #tpu.contract_precision<fp32>} : vector<32x32xf32>, vector<32x1024xf32>, vector<32x1024xf32> -> vector<32x1024xf32>
    %cst_6 = arith.constant 1.000000e-01 : f32
    %5 = vector.broadcast %cst_6 : f32 to vector<32x1024xf32>
    %6 = arith.mulf %5, %4 : vector<32x1024xf32>
    %7 = arith.maximumf %4, %6 : vector<32x1024xf32>
    %cst_7 = arith.constant dense<0.000000e+00> : vector<16x1024xf32>
    %8 = tpu.matmul %1, %7, %cst_7 {dimension_numbers = #tpu.dot_dimension_numbers<[1], [0], [0], [1], [0, 0, 1, 1], [], []>, precision = #tpu.contract_precision<fp32>} : vector<16x32xf32>, vector<32x1024xf32>, vector<16x1024xf32> -> vector<16x1024xf32>
    %cst_8 = arith.constant 1.000000e-01 : f32
    %9 = vector.broadcast %cst_8 : f32 to vector<16x1024xf32>
    %10 = arith.mulf %9, %8 : vector<16x1024xf32>
    %11 = arith.maximumf %8, %10 : vector<16x1024xf32>
    %c0_9 = arith.constant 0 : index
    %c0_10 = arith.constant 0 : index
    %c0_11 = arith.constant 0 : index
    %12 = vector.load %arg5[%c0_9, %c0_10, %c0_11] : memref<1x16x1024xf32, #tpu.memory_space<vmem>>, vector<1x16x1024xf32>
    %13 = vector.shape_cast %12 : vector<1x16x1024xf32> to vector<16x1024xf32>
    %14 = vector.shape_cast %11 : vector<16x1024xf32> to vector<1x16x1024xf32>
    tpu.vector_store %arg5[%c0_9, %c0_10, %c0_11], %14 {strides = array<i32>} : memref<1x16x1024xf32, #tpu.memory_space<vmem>>, vector<1x16x1024xf32>,
    return
  }
  func.func @transform_0(%arg0: i32, %arg1: i32) -> (i32, i32, i32) {
    %c0_i32 = arith.constant 0 : i32
    %c0_i32_0 = arith.constant 0 : i32
    return %arg0, %c0_i32, %arg1 : i32, i32, i32
  }
  func.func @transform_1(%arg0: i32, %arg1: i32) -> (i32, i32) {
    %c0_i32 = arith.constant 0 : i32
    %c0_i32_0 = arith.constant 0 : i32
    %c0_i32_1 = arith.constant 0 : i32
    return %c0_i32, %c0_i32_0 : i32, i32
  }
  func.func @transform_2(%arg0: i32, %arg1: i32) -> (i32, i32) {
    %c0_i32 = arith.constant 0 : i32
    %c0_i32_0 = arith.constant 0 : i32
    %c0_i32_1 = arith.constant 0 : i32
    return %c0_i32, %c0_i32_0 : i32, i32
  }
  func.func @transform_3(%arg0: i32, %arg1: i32) -> (i32, i32, i32) {
    %c0_i32 = arith.constant 0 : i32
    %c0_i32_0 = arith.constant 0 : i32
    return %arg0, %c0_i32, %arg1 : i32, i32, i32
  }
}

</mosaic_0001>

<bundles_post_ra>
// kernel: tpu_custom_call.1
= control target key start
LH: loop header
LB: loop body
LE: loop exit
PB: predicated region body
PF: predicated region fallthrough
CT: control target
= control target key end

     0   :  { %8 = vsyncpa [#allocation3], 0  ;;  %s7731_s0 = inlined_call_operand.hbm [shape: f32[2,32,1024], index: 0, kind: input, shape index: {}]   ;;  %s7732_s1 = inlined_call_operand.hbm [shape: f32[32,32], index: 1, kind: input, shape index: {}]   ;;  %s7733_s2 = inlined_call_operand.hbm [shape: f32[16,32], index: 2, kind: input, shape index: {}]   ;;  %s7734_s3 = inlined_call_operand.hbm [shape: f32[2,16,1024], index: 3, kind: output, shape index: {}]  }
   0x1   :  { %10 = vsyncpa [#allocation3 + $0x1], 0 }
   0x2   :  { %11 = vsyncpa [#allocation6], 0 }
   0x3   :  { %12 = vsyncpa [#allocation4], 0 }
   0x4   :  { %14 = vsyncpa [#allocation4 + $0x1], 0  ;;  %s5965_s12 = smov 0   ;;  %s5967_s13 = smov 0  }
   0x5   :  { %s5969_s14 = smov 0   ;;  %s5971_s15 = smov 0  }
   0x6   :  { %s5973_s16 = smov 0   ;;  %s5975_s17 = smov 0  }
   0x7 LB: > { %s5657_s18 = sadd.s32 4294967295, %s5932_s17   ;;  %s5658_s19 = sadd.s32 4294967294, %s5932_s17   ;;  %s5932_s17 = sphi %s5975_s17, %s20_s17   ;;  %s5928_s16 = sphi %s5973_s16, %s7768_s16   ;;  %s5924_s15 = sphi %s5971_s15, %s7767_s15   ;;  %s5920_s14 = sphi %s5969_s14, %s7766_s14   ;;  %s5916_s13 = sphi %s5967_s13, %s7765_s13   ;;  %s5912_s12 = sphi %s5965_s12, %s7764_s12  }
   0x8   : > { %p54_p0 = scmp.ne.s32.totalorder %s5916_s13, %s5912_s12  ;;  %p5999_p1 = scmp.eq.s32.totalorder %s5657_s18, 0 }
   0x9   : > { %p6003_p2 = scmp.eq.s32.totalorder %s5657_s18, 1  ;;  %p128_p3 = scmp.eq.s32.totalorder %s5658_s19, 1 }
   0xa   : > { %s7745_s20 = scalar_select %p5999_p1, 1, 0 }
   0xb   : > { %p6009_p4 = por %p5999_p1, %p54_p0  ;;  %p5659_p5 = scmp.ge.s32.totalorder %s5932_s17, 1 }
   0xc   : > { %p6014_p6 = por %p128_p3, %p54_p0  ;;  %p135_p7 = scmp.lt.s32.totalorder %s5932_s17, 3 }
   0xd   : > { %s7747_s22 = scalar_select %p6009_p4, 1, 0 }
   0xe   : > { %s7748_s23 = scalar_select %p6014_p6, 1, 0 }
   0xf   : > { %p6019_p8 = pnand %p5659_p5, %p135_p7  ;;  %s5934_s25 = smov [#allocation5]  }
  0x10   : > { %s147_s26 = sshll.u32 %s5934_s25, 4  ;;  %s5935_s28 = smov [#allocation7]   ;;  %s148_s26 = int_to_ptr.vmem [resolvable:$true] %s147_s26 }
  0x11   : > { %p5690_p9 = pneg %p6019_p8  ;;  %s160_s29 = sshll.u32 %s5935_s28, 4  ;;  %s161_s29 = int_to_ptr.vmem [resolvable:$true] %s160_s29 }
  0x12   : > { %s5779_s30 = scalar_lea.vmem %s148_s26, 512  ;;  %p5787_p5 = scmp.lt.s32.totalorder %s148_s26, %s148_s26 }
  0x13   : > { %p6028_p11 = pnand %p5690_p9, %p5999_p1  ;;  %p5780_p13 = scmp.ne.s32.totalorder %s148_s26, %s5779_s30 }
  0x14   : > { %p5788_p7 = scmp.lt.s32.totalorder %s5779_s30, %s5779_s30 }
  0x15   : > { %p5770_p12 = pneg %p6028_p11 }
  0x16   : > { %p5789_p10 = por %p5788_p7, %p5787_p5 }
  0x17   : > { %p5782_p0 = pnand %p5780_p13, %p5770_p12 }
  0x19   : > { %p5783_p3 = pneg %p5782_p0 }
  0x1b   : > { %p5790_p9 = pnand %p5789_p10, %p5783_p3 }
  0x1d   : > { %5793 = shalt.err (!%p5790_p9)
}
  0x1e   : > { %s5936_s4 = smov 128   ;;  %s5937_s5 = smov 8  }
  0x1f   : > { %5693 = dma.hbm_to_vmem [thread:$0]  (!%p6028_p11), %s7732_s1, 512, %s148_s26, [#allocation6], %s5936_s4, %s5936_s4, %s5937_s5  }
  0x20   : > { %s5805_s8 = scalar_lea.vmem %s161_s29, 256  ;;  %p5813_p1 = scmp.lt.s32.totalorder %s161_s29, %s161_s29 }
  0x21   : > { %p5806_p6 = scmp.ne.s32.totalorder %s161_s29, %s5805_s8  ;;  %p5814_p4 = scmp.lt.s32.totalorder %s5805_s8, %s5805_s8 }
  0x23   : > { %p5808_p13 = pnand %p5806_p6, %p5770_p12  ;;  %p5815_p5 = por %p5814_p4, %p5813_p1 }
  0x25   : > { %p5809_p0 = pneg %p5808_p13 }
  0x27   : > { %p5816_p10 = pnand %p5815_p5, %p5809_p0 }
  0x29   : > { %5819 = shalt.err (!%p5816_p10)
}
  0x2a   : > { %5696 = dma.hbm_to_vmem [thread:$0]  (!%p6028_p11), %s7733_s2, 256, %s161_s29, [#allocation6], %s5936_s4, %s5936_s4, %s5937_s5  }
  0x2b   : > { %s32_s11 = sadd.s32 1, %s5928_s16  ;;  %s41_s18 = sadd.s32 1, %s5920_s14 }
  0x2c   : > { %p34_p1 = scmp.ge.s32.totalorder %s32_s11, 2  ;;  %p48_p4 = scmp.ne.s32.totalorder %s5920_s14, %s5916_s13 }
  0x2d   : > { %p49_p6 = scmp.eq.s32.totalorder %s5932_s17, 0  ;;  %p5707_p12 = scmp.lt.s32.totalorder %s5932_s17, 2 }
  0x2e   : > { %s7770_s11 = smov (%p34_p1, %s32_s11), 0  ;;  %p6060_p7 = por %p6003_p2, %p48_p4 }
  0x2f   : > { %p50_p3 = por %p49_p6, %p48_p4  ;;  %s36_s25 = ssub.s32 %s5928_s16, %s7770_s11 }
  0x30   : > { %s174_s26 = sand.u32 1, %s5920_s14   ;;  %p39_p9 = scmp.eq.s32.totalorder %s36_s25, 0 }
  0x31   : > { %s5663_s27 = sshll.u32 %s174_s26, 8  ;;  %s5676_s28 = sshll.u32 %s5928_s16, 12 }
  0x32   : > { %s6069_s29 = scalar_select %p39_p9, %s5920_s14, %s41_s18  }
  0x33   : > { %s186_s5 = scalar_lea.hbm %s7731_s0, %s5676_s28  ;;  %s178_s6 = scalar_lea.vmem [#allocation2], %s5663_s27 }
  0x34   : > { %s187_s7 = sshll.u32 %s178_s6, 4  ;;  %p6076_p11 = pnand %p5707_p12, %p50_p3  ;;  %s188_s7 = int_to_ptr.vmem [resolvable:$true] %s187_s7 }
  0x35   : > { %s175_s8 = scalar_lea.sflag [#allocation3], %s174_s26  ;;  %s5833_s9 = scalar_lea.vmem %s188_s7, 4096 }
  0x36   : > { %p5822_p2 = pneg %p6076_p11  ;;  %p5834_p13 = scmp.ne.s32.totalorder %s188_s7, %s5833_s9 }
  0x37   : > { %s5938_s10 = smov [#allocation2]  }
  0x38   : > { %p5836_p0 = pnand %p5834_p13, %p5822_p2  ;;  %s5838_s18 = sshll.u32 %s5938_s10, 4  ;;  %s5839_s18 = int_to_ptr.vmem [resolvable:$false] %s5838_s18 }
  0x39   : > { %s5840_s25 = scalar_lea.vmem %s5839_s18, 8192  ;;  %p5841_p10 = scmp.lt.s32.totalorder %s188_s7, %s5839_s18 }
  0x3a   : > { %p5837_p5 = pneg %p5836_p0  ;;  %p5842_p1 = scmp.lt.s32.totalorder %s5840_s25, %s5833_s9 }
  0x3c   : > { %p5843_p4 = por %p5842_p1, %p5841_p10 }
  0x3e   : > { %p5844_p6 = pnand %p5843_p4, %p5837_p5 }
  0x40   : > { %5847 = shalt.err (!%p5844_p6)
}
  0x41   : > { %s5939_s27 = smov 1024   ;;  %s5940_s28 = smov 64  }
  0x42   : > { %5700 = dma.hbm_to_vmem [thread:$0]  (!%p6076_p11), %s186_s5, 4096, %s188_s7, %s175_s8, %s5939_s27, %s5939_s27, %s5940_s28  }
  0x43   : > { %199 = sbr.rel (%p6019_p8) target bundleno = 746 (0x2ea), region = 32  ;;  %s6087_s26 = sand.u32 (!%p6019_p8), 1, %s5916_s13  }
  0x44   : > { %s5667_s30 = sshll.u32 (!%p6019_p8), %s6087_s26, 8  ;;  %s202_s4 = scalar_lea.sflag (!%p6019_p8), [#allocation3], %s6087_s26 }
  0x45   : > { %s6091_s6 = scalar_lea.vmem (!%p6019_p8), [#allocation2], %s5667_s30  ;;  %p7753_p12 = scmp.ne.s32.totalorder (!%p6019_p8), %s7747_s22, 0 }
  0x48   : > { %5899 = dma.done.wait (%p7753_p12), %s202_s4, 4096  }
  0x49   : > { %5901 = vsyncadd (%p7753_p12), %s202_s4, 4294963200  ;;  %p7754_p3 = scmp.ne.s32.totalorder %s7745_s20, 0 }
  0x4b   : > { %5903 = dma.done.wait (%p7754_p3), [#allocation6], 768  }
  0x4c   : > { %5905 = vsyncadd (%p7754_p3), [#allocation6], 4294966528  ;;  %v5941_v0 = vmov 0.0   ;;  %v269_v1 = vld [vmem:[%s6091_s6 + $0xc8] sm:$0xff]  ;;  %v268_v2 = vld [vmem:[%s6091_s6 + $0xc0] sm:$0xff]  ;;  %vm276_vm0 = vcmask 261120  }
  0x4d   : > { %361 = vmatprep.mubr.f32.mxu0 %v5941_v0  ;;  %510 = vmatprep.mubr.f32.mxu1 %v5941_v0  ;;  %v261_v3 = vld [vmem:[%s6091_s6 + $0x88] sm:$0xff]  ;;  %v6106_v4 = vand.u32 4294901760, %v269_v1  ;;  %v6108_v5 = vand.u32 4294901760, %v268_v2  ;;  %v260_v7 = vld [vmem:[%s6091_s6 + $0x80] sm:$0xff]  ;;  %v240_v45 = vld [vmem:[#allocation5 + $0x10] sm:$0xff]  ;;  %s5670_s20 = sshll.u32 %s6087_s26, 7 }
  0x4e   : > { %v6110_v6 = vand.u32 4294901760, %v261_v3  ;;  %v253_v8 = vld [vmem:[%s6091_s6 + $0x48] sm:$0xff]  ;;  %v252_v9 = vld [vmem:[%s6091_s6 + $0x40] sm:$0xff]  ;;  %v6115_v10 = vand.u32 4294901760, %v260_v7  ;;  %v241_v46 = vld [vmem:[#allocation5 + $0x18] sm:$0xff]  ;;  %v284_v57 = vsel %vm276_vm0, %v240_v45, 0 }
  0x4f   : > { %v6117_v11 = vand.u32 4294901760, %v253_v8  ;;  %v6119_v12 = vand.u32 4294901760, %v252_v9  ;;  %v245_v13 = vld [vmem:[%s6091_s6 + $0x8] sm:$0xff]  ;;  %v244_v14 = vld [vmem:[%s6091_s6] sm:$0xff]  ;;  %314 = vmatprep.subr.mxu0 %v6106_v4  ;;  %v6129_v18 = vsub.f32 %v269_v1, %v6106_v4  ;;  %v6136_v22 = vsub.f32 %v268_v2, %v6108_v5  ;;  %s7658_s22 = scalar_lea.vmem [#allocation8], %s5670_s20  ;;  %s5677_s24 = sshll.u32 %s5924_s15, 11 }
  0x50   : > { %v238_v15 = vld [vmem:[#allocation5] sm:$0xff]  ;;  %v6124_v16 = vand.u32 4294901760, %v245_v13  ;;  %v6126_v17 = vand.u32 4294901760, %v244_v14  ;;  %v239_v20 = vld [vmem:[#allocation5 + $0x8] sm:$0xff]  ;;  %316 = vmatpush1.msra.mxu0 %v6108_v5  ;;  %v6139_v23 = vsub.f32 %v261_v3, %v6110_v6  ;;  %v6142_v24 = vsub.f32 %v260_v7, %v6115_v10  ;;  %s5551_s5 = sshll.u32 %s7658_s22, 4  ;;  %s7679_s8 = scalar_lea.hbm %s7734_s3, %s5677_s24  ;;  %s7681_s5 = int_to_ptr.vmem [resolvable:$true] %s5551_s5 }
  0x51   : > { %v278_v19 = vsel %vm276_vm0, %v238_v15, 0  ;;  %318 = vmatprep.subr.mxu0 %v6110_v6  ;;  %v432_v25 = vand.u32 4294901760, %v6129_v18  ;;  %v6147_v26 = vsub.f32 %v253_v8, %v6117_v11  ;;  %v281_v27 = vsel %vm276_vm0, %v239_v20, 0  ;;  %s5536_s9 = scalar_lea.sflag [#allocation4], %s6087_s26  ;;  %s5848_s10 = scalar_lea.vmem %s7681_s5, 2048 }
  0x52   : > { %v6133_v21 = vand.u32 4294901760, %v278_v19  ;;  %v6151_v28 = vsub.f32 %v252_v9, %v6119_v12  ;;  %320 = vmatpush1.msra.mxu0 %v6115_v10  ;;  %v438_v30 = vand.u32 4294901760, %v6136_v22  ;;  %v444_v31 = vand.u32 4294901760, %v6139_v23  ;;  %p5849_p8 = scmp.ne.s32.totalorder %s7681_s5, %s5848_s10  ;;  %s5942_s15 = smov [#allocation8]  }
  0x53   : > { %v450_v32 = vand.u32 4294901760, %v6142_v24  ;;  %322 = vmatprep.subr.mxu0 %v6117_v11  ;;  %v433_v33 = vsub.f32 %v6129_v18, %v432_v25  ;;  %v456_v34 = vand.u32 4294901760, %v6147_v26  ;;  %v6165_v35 = vand.u32 4294901760, %v281_v27  ;;  %s5852_s18 = sshll.u32 %s5942_s15, 4  ;;  %s5853_s18 = int_to_ptr.vmem [resolvable:$false] %s5852_s18 }
  0x54   : > { %v6155_v29 = vsub.f32 %v278_v19, %v6133_v21  ;;  %v462_v36 = vand.u32 4294901760, %v6151_v28  ;;  %324 = vmatpush1.msra.mxu0 %v6119_v12  ;;  %v439_v38 = vsub.f32 %v6136_v22, %v438_v30  ;;  %v445_v39 = vsub.f32 %v6139_v23, %v444_v31  ;;  %p5850_p9 = pnand %p5849_p8, %p6060_p7  ;;  %s5854_s25 = scalar_lea.vmem %s5853_s18, 4096 }
  0x55   : > { %v451_v40 = vsub.f32 %v6142_v24, %v450_v32  ;;  %326 = vmatprep.subr.mxu0 %v6124_v16  ;;  %v434_v41 = vand.u32 4294901760, %v433_v33  ;;  %v457_v42 = vsub.f32 %v6147_v26, %v456_v34  ;;  %v6186_v43 = vsub.f32 %v281_v27, %v6165_v35  ;;  %p5855_p2 = scmp.lt.s32.totalorder %s7681_s5, %s5853_s18  ;;  %p5856_p13 = scmp.lt.s32.totalorder %s5854_s25, %s5848_s10 }
  0x56   : > { %v6170_v37 = vand.u32 4294901760, %v6155_v29  ;;  %v463_v44 = vsub.f32 %v6151_v28, %v462_v36  ;;  %328 = vmatpush1.msra.mxu0 %v6126_v17  ;;  %v440_v48 = vand.u32 4294901760, %v439_v38  ;;  %v446_v49 = vand.u32 4294901760, %v445_v39  ;;  %v271_v38 = vld [vmem:[%s6091_s6 + $0xd8] sm:$0xff]  ;;  %p5851_p11 = pneg %p5850_p9 }
  0x57   : > { %v452_v50 = vand.u32 4294901760, %v451_v40  ;;  %435 = vmatprep.subr.mxu1 %v434_v41  ;;  %v458_v51 = vand.u32 4294901760, %v457_v42  ;;  %v6195_v52 = vand.u32 4294901760, %v6186_v43  ;;  %v6198_v54 = vsub.f32 %v245_v13, %v6124_v16  ;;  %565 = vmatprep.subr.mxu0 %v6129_v18  ;;  %v270_v40 = vld [vmem:[%s6091_s6 + $0xd0] sm:$0xff]  ;;  %v263_v41 = vld [vmem:[%s6091_s6 + $0x98] sm:$0xff]  ;;  %p5857_p0 = por %p5856_p13, %p5855_p2 }
  0x58   : > { %v365_v47 = vsub.f32 %v6155_v29, %v6170_v37  ;;  %v464_v53 = vand.u32 4294901760, %v463_v44  ;;  %441 = vmatpush1.msra.mxu1 %v440_v48  ;;  %v6204_v56 = vsub.f32 %v244_v14, %v6126_v17  ;;  %v287_v58 = vsel %vm276_vm0, %v241_v46, 0  ;;  %v262_v18 = vld [vmem:[%s6091_s6 + $0x90] sm:$0xff] }
  0x59   : > { %447 = vmatprep.subr.mxu1 %v446_v49  ;;  %v376_v59 = vsub.f32 %v6186_v43, %v6195_v52  ;;  %v468_v60 = vand.u32 4294901760, %v6198_v54  ;;  %v6211_v61 = vand.u32 4294901760, %v284_v57  ;;  %v6213_v62 = vand.u32 4294901760, %v287_v58  ;;  %p5858_p5 = pnand %p5857_p0, %p5851_p11 }
  0x5a   : > { %v6201_v55 = vand.u32 4294901760, %v365_v47  ;;  %453 = vmatpush1.msra.mxu1 %v452_v50  ;;  %v474_v63 = vand.u32 4294901760, %v6204_v56  ;;  %v6274_v39 = vand.u32 4294901760, %v271_v38  ;;  %v6286_v42 = vand.u32 4294901760, %v270_v40 }
  0x5b   : > { %459 = vmatprep.subr.mxu1 %v458_v51  ;;  %v6218_v1 = vand.u32 4294901760, %v376_v59  ;;  %v469_v2 = vsub.f32 %v6198_v54, %v468_v60  ;;  %v6224_v3 = vsub.f32 %v284_v57, %v6211_v61  ;;  %v6227_v7 = vsub.f32 %v287_v58, %v6213_v62 }
  0x5c   : > { %367 = vmatmul.mubr.f32.vlgmr.msra.gmra.mxu0 %v6201_v55  ;;  %465 = vmatpush1.msra.mxu1 %v464_v53  ;;  %v475_v8 = vsub.f32 %v6204_v56, %v474_v63  ;;  %v6291_v44 = vsub.f32 %v271_v38, %v6274_v39  ;;  %v6293_v45 = vand.u32 4294901760, %v263_v41 }
  0x5d   : > { %372 = vmatprep.mubr.f32.mxu0 %v5941_v0  ;;  %568 = vmatpush1.msra.mxu0 %v6136_v22  ;;  %v470_v9 = vand.u32 4294901760, %v469_v2  ;;  %v6234_v13 = vand.u32 4294901760, %v6224_v3  ;;  %v6238_v14 = vand.u32 4294901760, %v6227_v7  ;;  %v6307_v22 = vand.u32 4294901760, %v262_v18 }
  0x5e   : > { %571 = vmatprep.subr.mxu0 %v6139_v23  ;;  %v476_v15 = vand.u32 4294901760, %v475_v8  ;;  %v1122_v23 = vand.u32 4294901760, %v6291_v44 }
  0x5f   : > { %471 = vmatprep.subr.mxu1 %v470_v9  ;;  %v387_v19 = vsub.f32 %v6224_v3, %v6234_v13  ;;  %v398_v20 = vsub.f32 %v6227_v7, %v6238_v14  ;;  %574 = vmatpush1.msra.mxu0 %v6142_v24  ;;  %v6314_v24 = vsub.f32 %v263_v41, %v6293_v45 }
  0x60   : > { %378 = vmatmul.mubr.f32.gmra.mxu0 %v6218_v1  ;;  %477 = vmatpush1.msra.mxu1 %v476_v15  ;;  %v6331_v46 = vsub.f32 %v262_v18, %v6307_v22  ;;  %v272_v18 = vld [vmem:[%s6091_s6 + $0xe0] sm:$0xff] }
  0x61   : > { %383 = vmatprep.mubr.f32.mxu0 %v5941_v0  ;;  %512 = vmatmul.mubr.f32.vlgmr.msra.gmra.mxu1 %v6133_v21  ;;  %v6249_v27 = vand.u32 4294901760, %v387_v19  ;;  %v6255_v33 = vand.u32 4294901760, %v398_v20 }
  0x62   : > { %677 = vmatprep.subr.mxu1 %v6106_v4  ;;  %517 = vmatprep.mubr.f32.mxu1 %v5941_v0  ;;  %v1140_v49 = vand.u32 4294901760, %v6331_v46 }
  0x63   : > { %679 = vmatpush1.msra.mxu1 %v6108_v5  ;;  %577 = vmatprep.subr.mxu0 %v6147_v26 }
  0x64   : > { %389 = vmatmul.mubr.f32.gmra.mxu0 %v6249_v27  ;;  %681 = vmatprep.subr.mxu1 %v6110_v6 }
  0x65   : > { %394 = vmatprep.mubr.f32.mxu0 %v5941_v0  ;;  %519 = vmatmul.mubr.f32.gmra.mxu1 %v6165_v35 }
  0x66   : > { %580 = vmatpush1.msra.mxu0 %v6151_v28  ;;  %683 = vmatpush1.msra.mxu1 %v6115_v10  ;;  %v1123_v28 = vsub.f32 %v6291_v44, %v1122_v23 }
  0x67   : > { %524 = vmatprep.mubr.f32.mxu1 %v5941_v0  ;;  %583 = vmatprep.subr.mxu0 %v6198_v54 }
  0x68   : > { %400 = vmatmul.mubr.f32.gmra.mxu0 %v6255_v33  ;;  %685 = vmatprep.subr.mxu1 %v6117_v11 }
  0x69   : > { %586 = vmatpush1.msra.mxu0 %v6204_v56  ;;  %619 = vmatprep.mubr.f32.mxu0 %v5941_v0  ;;  %v1141_v56 = vsub.f32 %v6331_v46, %v1140_v49 }
  0x6a   : > { %526 = vmatmul.mubr.f32.gmra.mxu1 %v6211_v61  ;;  %788 = vmatprep.subr.mxu0 %v432_v25  ;;  %v255_v25 = vld [vmem:[%s6091_s6 + $0x58] sm:$0xff] }
  0x6b   : > { %687 = vmatpush1.msra.mxu1 %v6119_v12  ;;  %531 = vmatprep.mubr.f32.mxu1 %v5941_v0 }
  0x6c   : > { %622 = vmatmul.mubr.f32.vlgmr.msra.gmra.mxu0 %v6155_v29  ;;  %689 = vmatprep.subr.mxu1 %v6124_v16 }
  0x6d   : > { %627 = vmatprep.mubr.f32.mxu0 %v5941_v0  ;;  %691 = vmatpush1.msra.mxu1 %v6126_v17 }
  0x6e   : > { %533 = vmatmul.mubr.f32.gmra.mxu1 %v6213_v62  ;;  %792 = vmatpush1.msra.mxu0 %v438_v30  ;;  %v254_v30 = vld [vmem:[%s6091_s6 + $0x50] sm:$0xff] }
  0x6f   : > { %724 = vmatprep.mubr.f32.mxu1 %v5941_v0  ;;  %903 = vmatprep.subr.mxu1 %v6106_v4  ;;  %v6305_v4 = vsub.f32 %v270_v40, %v6286_v42  ;;  %v6333_v26 = vand.u32 4294901760, %v254_v30  ;;  %v273_v40 = vld [vmem:[%s6091_s6 + $0xe8] sm:$0xff] }
  0x70   : > { %630 = vmatmul.mubr.f32.gmra.mxu0 %v6186_v43  ;;  %796 = vmatprep.subr.mxu0 %v444_v31  ;;  %v6324_v31 = vand.u32 4294901760, %v255_v25  ;;  %v6450_v41 = vand.u32 4294901760, %v273_v40 }
  0x71   : > { %635 = vmatprep.mubr.f32.mxu0 %v5941_v0  ;;  %800 = vmatpush1.msra.mxu0 %v450_v32  ;;  %v1128_v32 = vand.u32 4294901760, %v6305_v4  ;;  %v6361_v50 = vsub.f32 %v254_v30, %v6333_v26  ;;  %v6462_v30 = vand.u32 4294901760, %v272_v18 }
  0x72   : > { %728 = vmatmul.mubr.f32.vlgmr.msra.gmra.mxu1 %v6170_v37  ;;  %804 = vmatprep.subr.mxu0 %v456_v34  ;;  %v6352_v47 = vsub.f32 %v255_v25, %v6324_v31  ;;  %v265_v25 = vld [vmem:[%s6091_s6 + $0xa8] sm:$0xff] }
  0x73   : > { %905 = vmatpush1.msra.mxu1 %v6108_v5  ;;  %733 = vmatprep.mubr.f32.mxu1 %v5941_v0  ;;  %v247_v5 = vld [vmem:[%s6091_s6 + $0x18] sm:$0xff]  ;;  %v1129_v48 = vsub.f32 %v6305_v4, %v1128_v32 }
  0x74   : > { %638 = vmatmul.mubr.f32.gmra.mxu0 %v6224_v3  ;;  %907 = vmatprep.subr.mxu1 %v6110_v6  ;;  %v246_v6 = vld [vmem:[%s6091_s6 + $0x10] sm:$0xff]  ;;  %v6342_v34 = vand.u32 4294901760, %v247_v5 }
  0x75   : > { %643 = vmatprep.mubr.f32.mxu0 %v5941_v0  ;;  %808 = vmatpush1.msra.mxu0 %v462_v36  ;;  %v6347_v36 = vand.u32 4294901760, %v246_v6  ;;  %v1130_v54 = vand.u32 4294901760, %v1129_v48 }
  0x76   : > { %737 = vmatmul.mubr.f32.gmra.mxu1 %v6195_v52  ;;  %812 = vmatprep.subr.mxu0 %v468_v60  ;;  %v6369_v51 = vsub.f32 %v247_v5, %v6342_v34  ;;  %v6467_v5 = vsub.f32 %v273_v40, %v6450_v41 }
  0x77   : > { %909 = vmatpush1.msra.mxu1 %v6115_v10  ;;  %742 = vmatprep.mubr.f32.mxu1 %v5941_v0  ;;  %v1134_v10 = vand.u32 4294901760, %v6314_v24  ;;  %v6374_v53 = vsub.f32 %v246_v6, %v6347_v36  ;;  %v6469_v6 = vand.u32 4294901760, %v265_v25 }
  0x78   : > { %646 = vmatmul.mubr.f32.gmra.mxu0 %v6227_v7  ;;  %911 = vmatprep.subr.mxu1 %v6117_v11  ;;  %v1124_v11 = vand.u32 4294901760, %v1123_v28  ;;  %v1158_v58 = vand.u32 4294901760, %v6369_v51 }
  0x79   : > { %816 = vmatpush1.msra.mxu0 %v474_v63  ;;  %849 = vmatprep.mubr.f32.mxu0 %v5941_v0  ;;  %v1164_v59 = vand.u32 4294901760, %v6374_v53  ;;  %v1142_v63 = vand.u32 4294901760, %v1141_v56 }
  0x7a   : > { %746 = vmatmul.mubr.f32.gmra.mxu1 %v6234_v13  ;;  %1004 = vmatprep.subr.mxu0 %v6274_v39  ;;  %v1159_v8 = vsub.f32 %v6369_v51, %v1158_v58 }
  0x7b   : > { %913 = vmatpush1.msra.mxu1 %v6119_v12  ;;  %751 = vmatprep.mubr.f32.mxu1 %v5941_v0  ;;  %v1135_v12 = vsub.f32 %v6314_v24, %v1134_v10  ;;  %v1165_v9 = vsub.f32 %v6374_v53, %v1164_v59 }
  0x7c   : > { %851 = vmatmul.mubr.f32.vlgmr.msra.gmra.mxu0 %v6133_v21  ;;  %915 = vmatprep.subr.mxu1 %v6124_v16  ;;  %v1146_v16 = vand.u32 4294901760, %v6352_v47  ;;  %v1160_v20 = vand.u32 4294901760, %v1159_v8 }
  0x7d   : > { %856 = vmatprep.mubr.f32.mxu0 %v5941_v0  ;;  %917 = vmatpush1.msra.mxu1 %v6126_v17  ;;  %v1152_v17 = vand.u32 4294901760, %v6361_v50  ;;  %v1136_v57 = vand.u32 4294901760, %v1135_v12  ;;  %v1166_v38 = vand.u32 4294901760, %v1165_v9 }
  0x7e   : > { %755 = vmatmul.mubr.f32.gmra.mxu1 %v6238_v14  ;;  %1006 = vmatpush1.msra.mxu0 %v6286_v42  ;;  %v1147_v60 = vsub.f32 %v6352_v47, %v1146_v16 }
  0x7f   : > { %950 = vmatprep.mubr.f32.mxu1 %v5941_v0  ;;  %1125 = vmatprep.subr.mxu1 %v1124_v11  ;;  %v1153_v2 = vsub.f32 %v6361_v50, %v1152_v17 }
  0x80   : > { %858 = vmatmul.mubr.f32.gmra.mxu0 %v6165_v35  ;;  %1008 = vmatprep.subr.mxu0 %v6293_v45  ;;  %v1148_v15 = vand.u32 4294901760, %v1147_v60 }
  0x81   : > { %863 = vmatprep.mubr.f32.mxu0 %v5941_v0  ;;  %1010 = vmatpush1.msra.mxu0 %v6307_v22  ;;  %v1154_v19 = vand.u32 4294901760, %v1153_v2 }
  0x82   : > { %952 = vmatmul.mubr.f32.vlgmr.msra.gmra.mxu1 %v6133_v21  ;;  %1012 = vmatprep.subr.mxu0 %v6324_v31 }
  0x83   : > { %1131 = vmatpush1.msra.mxu1 %v1130_v54  ;;  %957 = vmatprep.mubr.f32.mxu1 %v5941_v0 }
  0x84   : > { %865 = vmatmul.mubr.f32.gmra.mxu0 %v6211_v61  ;;  %1137 = vmatprep.subr.mxu1 %v1136_v57 }
  0x85   : > { %870 = vmatprep.mubr.f32.mxu0 %v5941_v0  ;;  %1014 = vmatpush1.msra.mxu0 %v6333_v26 }
  0x86   : > { %959 = vmatmul.mubr.f32.gmra.mxu1 %v6165_v35  ;;  %1016 = vmatprep.subr.mxu0 %v6342_v34 }
  0x87   : > { %1143 = vmatpush1.msra.mxu1 %v1142_v63  ;;  %964 = vmatprep.mubr.f32.mxu1 %v5941_v0 }
  0x88   : > { %872 = vmatmul.mubr.f32.gmra.mxu0 %v6213_v62  ;;  %1149 = vmatprep.subr.mxu1 %v1148_v15 }
  0x89   : > { %1018 = vmatpush1.msra.mxu0 %v6347_v36  ;;  %1051 = vmatprep.mubr.f32.mxu0 %v5941_v0 }
  0x8a   : > { %966 = vmatmul.mubr.f32.gmra.mxu1 %v6211_v61  ;;  %1255 = vmatprep.subr.mxu0 %v6291_v44  ;;  %v264_v44 = vld [vmem:[%s6091_s6 + $0xa0] sm:$0xff] }
  0x8b   : > { %1155 = vmatpush1.msra.mxu1 %v1154_v19  ;;  %971 = vmatprep.mubr.f32.mxu1 %v5941_v0 }
  0x8c   : > { %1057 = vmatmul.mubr.f32.vlgmr.msra.gmra.mxu0 %v6201_v55  ;;  %1161 = vmatprep.subr.mxu1 %v1160_v20 }
  0x8d   : > { %1062 = vmatprep.mubr.f32.mxu0 %v5941_v0  ;;  %1167 = vmatpush1.msra.mxu1 %v1166_v38 }
  0x8e   : > { %973 = vmatmul.mubr.f32.gmra.mxu1 %v6213_v62  ;;  %1258 = vmatpush1.msra.mxu0 %v6305_v4  ;;  %v6483_v4 = vand.u32 4294901760, %v264_v44 }
  0x8f   : > { %1200 = vmatprep.mubr.f32.mxu1 %v5941_v0  ;;  %1367 = vmatprep.subr.mxu1 %v6274_v39 }
  0x90   : > { %1068 = vmatmul.mubr.f32.gmra.mxu0 %v6218_v1  ;;  %1261 = vmatprep.subr.mxu0 %v6314_v24  ;;  %v1812_v24 = vand.u32 4294901760, %v6467_v5  ;;  %v6507_v48 = vsub.f32 %v264_v44, %v6483_v4  ;;  %v274_v44 = vld [vmem:[%s6091_s6 + $0xf0] sm:$0xff] }
  0x91   : > { %1073 = vmatprep.mubr.f32.mxu0 %v5941_v0  ;;  %1264 = vmatpush1.msra.mxu0 %v6331_v46  ;;  %v256_v46 = vld [vmem:[%s6091_s6 + $0x60] sm:$0xff] }
  0x92   : > { %1202 = vmatmul.mubr.f32.vlgmr.msra.gmra.mxu1 %v6133_v21  ;;  %1267 = vmatprep.subr.mxu0 %v6352_v47  ;;  %v6509_v47 = vand.u32 4294901760, %v256_v46 }
  0x93   : > { %1369 = vmatpush1.msra.mxu1 %v6286_v42  ;;  %1207 = vmatprep.mubr.f32.mxu1 %v5941_v0 }
  0x94   : > { %1079 = vmatmul.mubr.f32.gmra.mxu0 %v6249_v27  ;;  %1371 = vmatprep.subr.mxu1 %v6293_v45 }
  0x95   : > { %1084 = vmatprep.mubr.f32.mxu0 %v5941_v0  ;;  %1270 = vmatpush1.msra.mxu0 %v6361_v50 }
  0x96   : > { %1209 = vmatmul.mubr.f32.gmra.mxu1 %v6165_v35  ;;  %1273 = vmatprep.subr.mxu0 %v6369_v51 }
  0x97   : > { %1373 = vmatpush1.msra.mxu1 %v6307_v22  ;;  %1214 = vmatprep.mubr.f32.mxu1 %v5941_v0 }
  0x98   : > { %1090 = vmatmul.mubr.f32.gmra.mxu0 %v6255_v33  ;;  %1375 = vmatprep.subr.mxu1 %v6324_v31 }
  0x99   : > { %1276 = vmatpush1.msra.mxu0 %v6374_v53  ;;  %1309 = vmatprep.mubr.f32.mxu0 %v5941_v0  ;;  %v1830_v53 = vand.u32 4294901760, %v6507_v48 }
  0x9a   : > { %1216 = vmatmul.mubr.f32.gmra.mxu1 %v6211_v61  ;;  %1478 = vmatprep.subr.mxu0 %v1122_v23  ;;  %v257_v23 = vld [vmem:[%s6091_s6 + $0x68] sm:$0xff] }
  0x9b   : > { %1377 = vmatpush1.msra.mxu1 %v6333_v26  ;;  %1221 = vmatprep.mubr.f32.mxu1 %v5941_v0  ;;  %v6500_v28 = vand.u32 4294901760, %v257_v23  ;;  %v1831_v57 = vsub.f32 %v6507_v48, %v1830_v53 }
  0x9c   : > { %1312 = vmatmul.mubr.f32.vlgmr.msra.gmra.mxu0 %v6155_v29  ;;  %1379 = vmatprep.subr.mxu1 %v6342_v34 }
  0x9d   : > { %1317 = vmatprep.mubr.f32.mxu0 %v5941_v0  ;;  %1381 = vmatpush1.msra.mxu1 %v6347_v36  ;;  %v6528_v12 = vsub.f32 %v257_v23, %v6500_v28  ;;  %v1832_v2 = vand.u32 4294901760, %v1831_v57  ;;  %v267_v23 = vld [vmem:[%s6091_s6 + $0xb8] sm:$0xff] }
  0x9e   : > { %1223 = vmatmul.mubr.f32.gmra.mxu1 %v6213_v62  ;;  %1482 = vmatpush1.msra.mxu0 %v1128_v32  ;;  %v6490_v32 = vsub.f32 %v265_v25, %v6469_v6 }
  0x9f   : > { %1414 = vmatprep.mubr.f32.mxu1 %v5941_v0  ;;  %1593 = vmatprep.subr.mxu1 %v6274_v39  ;;  %v6481_v39 = vsub.f32 %v272_v18, %v6462_v30  ;;  %v275_v18 = vld [vmem:[%s6091_s6 + $0xf8] sm:$0xff] }
  0xa0   : > { %1320 = vmatmul.mubr.f32.gmra.mxu0 %v6186_v43  ;;  %1486 = vmatprep.subr.mxu0 %v1134_v10  ;;  %v6626_v25 = vand.u32 4294901760, %v275_v18 }
  0xa1   : > { %1325 = vmatprep.mubr.f32.mxu0 %v5941_v0  ;;  %1490 = vmatpush1.msra.mxu0 %v1140_v49  ;;  %v1818_v10 = vand.u32 4294901760, %v6481_v39  ;;  %v1813_v49 = vsub.f32 %v6467_v5, %v1812_v24 }
  0xa2   : > { %1418 = vmatmul.mubr.f32.vlgmr.msra.gmra.mxu1 %v6170_v37  ;;  %1494 = vmatprep.subr.mxu0 %v1146_v16  ;;  %v6537_v16 = vsub.f32 %v256_v46, %v6509_v47  ;;  %v6638_v46 = vand.u32 4294901760, %v274_v44 }
  0xa3   : > { %1595 = vmatpush1.msra.mxu1 %v6286_v42  ;;  %1423 = vmatprep.mubr.f32.mxu1 %v5941_v0  ;;  %v249_v42 = vld [vmem:[%s6091_s6 + $0x28] sm:$0xff]  ;;  %v1819_v51 = vsub.f32 %v6481_v39, %v1818_v10 }
  0xa4   : > { %1328 = vmatmul.mubr.f32.gmra.mxu0 %v6224_v3  ;;  %1597 = vmatprep.subr.mxu1 %v6293_v45  ;;  %v248_v45 = vld [vmem:[%s6091_s6 + $0x20] sm:$0xff]  ;;  %v6518_v50 = vand.u32 4294901760, %v249_v42 }
  0xa5   : > { %1333 = vmatprep.mubr.f32.mxu0 %v5941_v0  ;;  %1498 = vmatpush1.msra.mxu0 %v1152_v17  ;;  %v6523_v11 = vand.u32 4294901760, %v248_v45  ;;  %v1820_v17 = vand.u32 4294901760, %v1819_v51 }
  0xa6   : > { %1427 = vmatmul.mubr.f32.gmra.mxu1 %v6195_v52  ;;  %1502 = vmatprep.subr.mxu0 %v1158_v58  ;;  %v6545_v54 = vsub.f32 %v249_v42, %v6518_v50  ;;  %v6643_v42 = vsub.f32 %v275_v18, %v6626_v25 }
  0xa7   : > { %1599 = vmatpush1.msra.mxu1 %v6307_v22  ;;  %1432 = vmatprep.mubr.f32.mxu1 %v5941_v0  ;;  %v1824_v22 = vand.u32 4294901760, %v6490_v32  ;;  %v6550_v56 = vsub.f32 %v248_v45, %v6523_v11  ;;  %v6645_v45 = vand.u32 4294901760, %v267_v23 }
  0xa8   : > { %1336 = vmatmul.mubr.f32.gmra.mxu0 %v6227_v7  ;;  %1601 = vmatprep.subr.mxu1 %v6324_v31  ;;  %v1814_v31 = vand.u32 4294901760, %v1813_v49 }
  0xa9   : > { %1506 = vmatpush1.msra.mxu0 %v1164_v59  ;;  %1539 = vmatprep.mubr.f32.mxu0 %v5941_v0  ;;  %v1848_v59 = vand.u32 4294901760, %v6545_v54  ;;  %v1854_v60 = vand.u32 4294901760, %v6550_v56 }
  0xaa   : > { %1436 = vmatmul.mubr.f32.gmra.mxu1 %v6234_v13  ;;  %1694 = vmatprep.subr.mxu0 %v6450_v41 }
  0xab   : > { %1603 = vmatpush1.msra.mxu1 %v6333_v26  ;;  %1441 = vmatprep.mubr.f32.mxu1 %v5941_v0  ;;  %v1825_v26 = vsub.f32 %v6490_v32, %v1824_v22  ;;  %v1849_v9 = vsub.f32 %v6545_v54, %v1848_v59  ;;  %v1855_v15 = vsub.f32 %v6550_v56, %v1854_v60 }
  0xac   : > { %1541 = vmatmul.mubr.f32.vlgmr.msra.gmra.mxu0 %v6133_v21  ;;  %1605 = vmatprep.subr.mxu1 %v6342_v34  ;;  %v1836_v34 = vand.u32 4294901760, %v6528_v12 }
  0xad   : > { %1546 = vmatprep.mubr.f32.mxu0 %v5941_v0  ;;  %1607 = vmatpush1.msra.mxu1 %v6347_v36  ;;  %v1842_v36 = vand.u32 4294901760, %v6537_v16  ;;  %v1826_v58 = vand.u32 4294901760, %v1825_v26  ;;  %v1850_v38 = vand.u32 4294901760, %v1849_v9  ;;  %v1856_v40 = vand.u32 4294901760, %v1855_v15 }
  0xae   : > { %1445 = vmatmul.mubr.f32.gmra.mxu1 %v6238_v14  ;;  %1696 = vmatpush1.msra.mxu0 %v6462_v30  ;;  %v1837_v63 = vsub.f32 %v6528_v12, %v1836_v34 }
  0xaf   : > { %1640 = vmatprep.mubr.f32.mxu1 %v5941_v0  ;;  %1815 = vmatprep.subr.mxu1 %v1814_v31  ;;  %v1843_v8 = vsub.f32 %v6537_v16, %v1842_v36 }
  0xb0   : > { %1548 = vmatmul.mubr.f32.gmra.mxu0 %v6165_v35  ;;  %1698 = vmatprep.subr.mxu0 %v6469_v6  ;;  %v1838_v19 = vand.u32 4294901760, %v1837_v63 }
  0xb1   : > { %1553 = vmatprep.mubr.f32.mxu0 %v5941_v0  ;;  %1700 = vmatpush1.msra.mxu0 %v6483_v4  ;;  %v1844_v20 = vand.u32 4294901760, %v1843_v8 }
  0xb2   : > { %1642 = vmatmul.mubr.f32.vlgmr.msra.gmra.mxu1 %v6133_v21  ;;  %1702 = vmatprep.subr.mxu0 %v6500_v28 }
  0xb3   : > { %1821 = vmatpush1.msra.mxu1 %v1820_v17  ;;  %1647 = vmatprep.mubr.f32.mxu1 %v5941_v0 }
  0xb4   : > { %1555 = vmatmul.mubr.f32.gmra.mxu0 %v6211_v61  ;;  %1827 = vmatprep.subr.mxu1 %v1826_v58 }
  0xb5   : > { %1560 = vmatprep.mubr.f32.mxu0 %v5941_v0  ;;  %1704 = vmatpush1.msra.mxu0 %v6509_v47 }
  0xb6   : > { %1649 = vmatmul.mubr.f32.gmra.mxu1 %v6165_v35  ;;  %1706 = vmatprep.subr.mxu0 %v6518_v50 }
  0xb7   : > { %1833 = vmatpush1.msra.mxu1 %v1832_v2  ;;  %1654 = vmatprep.mubr.f32.mxu1 %v5941_v0 }
  0xb8   : > { %1562 = vmatmul.mubr.f32.gmra.mxu0 %v6213_v62  ;;  %1839 = vmatprep.subr.mxu1 %v1838_v19 }
  0xb9   : > { %1708 = vmatpush1.msra.mxu0 %v6523_v11  ;;  %1741 = vmatprep.mubr.f32.mxu0 %v5941_v0 }
  0xba   : > { %1656 = vmatmul.mubr.f32.gmra.mxu1 %v6211_v61  ;;  %1945 = vmatprep.subr.mxu0 %v6467_v5  ;;  %v266_v5 = vld [vmem:[%s6091_s6 + $0xb0] sm:$0xff] }
  0xbb   : > { %1845 = vmatpush1.msra.mxu1 %v1844_v20  ;;  %1661 = vmatprep.mubr.f32.mxu1 %v5941_v0 }
  0xbc   : > { %1747 = vmatmul.mubr.f32.vlgmr.msra.gmra.mxu0 %v6201_v55  ;;  %1851 = vmatprep.subr.mxu1 %v1850_v38 }
  0xbd   : > { %1752 = vmatprep.mubr.f32.mxu0 %v5941_v0  ;;  %1857 = vmatpush1.msra.mxu1 %v1856_v40 }
  0xbe   : > { %1663 = vmatmul.mubr.f32.gmra.mxu1 %v6213_v62  ;;  %1948 = vmatpush1.msra.mxu0 %v6481_v39  ;;  %v6659_v39 = vand.u32 4294901760, %v266_v5 }
  0xbf   : > { %1890 = vmatprep.mubr.f32.mxu1 %v5941_v0  ;;  %2057 = vmatprep.subr.mxu1 %v6450_v41 }
  0xc0   : > { %1758 = vmatmul.mubr.f32.gmra.mxu0 %v6218_v1  ;;  %1951 = vmatprep.subr.mxu0 %v6490_v32  ;;  %v2502_v32 = vand.u32 4294901760, %v6643_v42  ;;  %v6683_v51 = vsub.f32 %v266_v5, %v6659_v39 }
  0xc1   : > { %1763 = vmatprep.mubr.f32.mxu0 %v5941_v0  ;;  %1954 = vmatpush1.msra.mxu0 %v6507_v48  ;;  %v258_v48 = vld [vmem:[%s6091_s6 + $0x70] sm:$0xff] }
  0xc2   : > { %1892 = vmatmul.mubr.f32.vlgmr.msra.gmra.mxu1 %v6133_v21  ;;  %1957 = vmatprep.subr.mxu0 %v6528_v12  ;;  %v6685_v12 = vand.u32 4294901760, %v258_v48 }
  0xc3   : > { %2059 = vmatpush1.msra.mxu1 %v6462_v30  ;;  %1897 = vmatprep.mubr.f32.mxu1 %v5941_v0 }
  0xc4   : > { %1769 = vmatmul.mubr.f32.gmra.mxu0 %v6249_v27  ;;  %2061 = vmatprep.subr.mxu1 %v6469_v6 }
  0xc5   : > { %1774 = vmatprep.mubr.f32.mxu0 %v5941_v0  ;;  %1960 = vmatpush1.msra.mxu0 %v6537_v16 }
  0xc6   : > { %1899 = vmatmul.mubr.f32.gmra.mxu1 %v6165_v35  ;;  %1963 = vmatprep.subr.mxu0 %v6545_v54 }
  0xc7   : > { %2063 = vmatpush1.msra.mxu1 %v6483_v4  ;;  %1904 = vmatprep.mubr.f32.mxu1 %v5941_v0 }
  0xc8   : > { %1780 = vmatmul.mubr.f32.gmra.mxu0 %v6255_v33  ;;  %2065 = vmatprep.subr.mxu1 %v6500_v28 }
  0xc9   : > { %1966 = vmatpush1.msra.mxu0 %v6550_v56  ;;  %1999 = vmatprep.mubr.f32.mxu0 %v5941_v0  ;;  %v2520_v56 = vand.u32 4294901760, %v6683_v51 }
  0xca   : > { %1906 = vmatmul.mubr.f32.gmra.mxu1 %v6211_v61  ;;  %2168 = vmatprep.subr.mxu0 %v1812_v24  ;;  %v259_v24 = vld [vmem:[%s6091_s6 + $0x78] sm:$0xff] }
  0xcb   : > { %2067 = vmatpush1.msra.mxu1 %v6509_v47  ;;  %1911 = vmatprep.mubr.f32.mxu1 %v5941_v0  ;;  %v6676_v49 = vand.u32 4294901760, %v259_v24  ;;  %v2521_v58 = vsub.f32 %v6683_v51, %v2520_v56 }
  0xcc   : > { %2002 = vmatmul.mubr.f32.vlgmr.msra.gmra.mxu0 %v6155_v29  ;;  %2069 = vmatprep.subr.mxu1 %v6518_v50 }
  0xcd   : > { %2007 = vmatprep.mubr.f32.mxu0 %v5941_v0  ;;  %2071 = vmatpush1.msra.mxu1 %v6523_v11  ;;  %v6704_v26 = vsub.f32 %v259_v24, %v6676_v49  ;;  %v2522_v8 = vand.u32 4294901760, %v2521_v58 }
  0xce   : > { %1913 = vmatmul.mubr.f32.gmra.mxu1 %v6213_v62  ;;  %2172 = vmatpush1.msra.mxu0 %v1818_v10  ;;  %v6666_v10 = vsub.f32 %v267_v23, %v6645_v45 }
  0xcf   : > { %2104 = vmatprep.mubr.f32.mxu1 %v5941_v0  ;;  %2283 = vmatprep.subr.mxu1 %v6450_v41  ;;  %v6657_v41 = vsub.f32 %v274_v44, %v6638_v46 }
  0xd0   : > { %2010 = vmatmul.mubr.f32.gmra.mxu0 %v6186_v43  ;;  %2176 = vmatprep.subr.mxu0 %v1824_v22 }
  0xd1   : > { %2015 = vmatprep.mubr.f32.mxu0 %v5941_v0  ;;  %2180 = vmatpush1.msra.mxu0 %v1830_v53  ;;  %v2508_v22 = vand.u32 4294901760, %v6657_v41  ;;  %v2503_v53 = vsub.f32 %v6643_v42, %v2502_v32 }
  0xd2   : > { %2108 = vmatmul.mubr.f32.vlgmr.msra.gmra.mxu1 %v6170_v37  ;;  %2184 = vmatprep.subr.mxu0 %v1836_v34  ;;  %v6713_v34 = vsub.f32 %v258_v48, %v6685_v12 }
  0xd3   : > { %2285 = vmatpush1.msra.mxu1 %v6462_v30  ;;  %2113 = vmatprep.mubr.f32.mxu1 %v5941_v0  ;;  %v251_v30 = vld [vmem:[%s6091_s6 + $0x38] sm:$0xff]  ;;  %v2509_v54 = vsub.f32 %v6657_v41, %v2508_v22 }
  0xd4   : > { %2018 = vmatmul.mubr.f32.gmra.mxu0 %v6224_v3  ;;  %2287 = vmatprep.subr.mxu1 %v6469_v6  ;;  %v250_v6 = vld [vmem:[%s6091_s6 + $0x30] sm:$0xff]  ;;  %v6694_v16 = vand.u32 4294901760, %v251_v30 }
  0xd5   : > { %2023 = vmatprep.mubr.f32.mxu0 %v5941_v0  ;;  %2188 = vmatpush1.msra.mxu0 %v1842_v36  ;;  %v6699_v31 = vand.u32 4294901760, %v250_v6  ;;  %v2510_v36 = vand.u32 4294901760, %v2509_v54 }
  0xd6   : > { %2117 = vmatmul.mubr.f32.gmra.mxu1 %v6195_v52  ;;  %2192 = vmatprep.subr.mxu0 %v1848_v59  ;;  %v6721_v17 = vsub.f32 %v251_v30, %v6694_v16 }
  0xd7   : > { %2289 = vmatpush1.msra.mxu1 %v6483_v4  ;;  %2122 = vmatprep.mubr.f32.mxu1 %v5941_v0  ;;  %v2514_v4 = vand.u32 4294901760, %v6666_v10  ;;  %v6726_v57 = vsub.f32 %v250_v6, %v6699_v31 }
  0xd8   : > { %2026 = vmatmul.mubr.f32.gmra.mxu0 %v6227_v7  ;;  %2291 = vmatprep.subr.mxu1 %v6500_v28  ;;  %v2504_v28 = vand.u32 4294901760, %v2503_v53 }
  0xd9   : > { %2196 = vmatpush1.msra.mxu0 %v1854_v60  ;;  %2229 = vmatprep.mubr.f32.mxu0 %v5941_v0  ;;  %v2538_v60 = vand.u32 4294901760, %v6721_v17  ;;  %v2544_v63 = vand.u32 4294901760, %v6726_v57 }
  0xda   : > { %2126 = vmatmul.mubr.f32.gmra.mxu1 %v6234_v13  ;;  %2384 = vmatprep.subr.mxu0 %v6626_v25 }
  0xdb   : > { %2293 = vmatpush1.msra.mxu1 %v6509_v47  ;;  %2131 = vmatprep.mubr.f32.mxu1 %v5941_v0  ;;  %v2515_v47 = vsub.f32 %v6666_v10, %v2514_v4  ;;  %v2539_v15 = vsub.f32 %v6721_v17, %v2538_v60  ;;  %v2545_v19 = vsub.f32 %v6726_v57, %v2544_v63 }
  0xdc   : > { %2231 = vmatmul.mubr.f32.vlgmr.msra.gmra.mxu0 %v6133_v21  ;;  %2295 = vmatprep.subr.mxu1 %v6518_v50  ;;  %v2526_v50 = vand.u32 4294901760, %v6704_v26 }
  0xdd   : > { %2236 = vmatprep.mubr.f32.mxu0 %v5941_v0  ;;  %2297 = vmatpush1.msra.mxu1 %v6523_v11  ;;  %v2532_v11 = vand.u32 4294901760, %v6713_v34  ;;  %v2516_v59 = vand.u32 4294901760, %v2515_v47  ;;  %v2540_v40 = vand.u32 4294901760, %v2539_v15  ;;  %v2546_v18 = vand.u32 4294901760, %v2545_v19 }
  0xde   : > { %2135 = vmatmul.mubr.f32.gmra.mxu1 %v6238_v14  ;;  %2386 = vmatpush1.msra.mxu0 %v6638_v46  ;;  %v2527_v2 = vsub.f32 %v6704_v26, %v2526_v50 }
  0xdf   : > { %2330 = vmatprep.mubr.f32.mxu1 %v5941_v0  ;;  %2505 = vmatprep.subr.mxu1 %v2504_v28  ;;  %v2533_v9 = vsub.f32 %v6713_v34, %v2532_v11 }
  0xe0   : > { %2238 = vmatmul.mubr.f32.gmra.mxu0 %v6165_v35  ;;  %2388 = vmatprep.subr.mxu0 %v6645_v45  ;;  %v2528_v20 = vand.u32 4294901760, %v2527_v2 }
  0xe1   : > { %2243 = vmatprep.mubr.f32.mxu0 %v5941_v0  ;;  %2390 = vmatpush1.msra.mxu0 %v6659_v39  ;;  %v2534_v38 = vand.u32 4294901760, %v2533_v9 }
  0xe2   : > { %2332 = vmatmul.mubr.f32.vlgmr.msra.gmra.mxu1 %v6133_v21  ;;  %2392 = vmatprep.subr.mxu0 %v6676_v49 }
  0xe3   : > { %2511 = vmatpush1.msra.mxu1 %v2510_v36  ;;  %2337 = vmatprep.mubr.f32.mxu1 %v5941_v0 }
  0xe4   : > { %2245 = vmatmul.mubr.f32.gmra.mxu0 %v6211_v61  ;;  %2517 = vmatprep.subr.mxu1 %v2516_v59 }
  0xe5   : > { %2250 = vmatprep.mubr.f32.mxu0 %v5941_v0  ;;  %2394 = vmatpush1.msra.mxu0 %v6685_v12 }
  0xe6   : > { %2339 = vmatmul.mubr.f32.gmra.mxu1 %v6165_v35  ;;  %2396 = vmatprep.subr.mxu0 %v6694_v16 }
  0xe7   : > { %2523 = vmatpush1.msra.mxu1 %v2522_v8  ;;  %2344 = vmatprep.mubr.f32.mxu1 %v5941_v0 }
  0xe8   : > { %2252 = vmatmul.mubr.f32.gmra.mxu0 %v6213_v62  ;;  %2529 = vmatprep.subr.mxu1 %v2528_v20  ;;  %v242_v20 = vld [vmem:[#allocation7] sm:$0xff] }
  0xe9   : > { %2398 = vmatpush1.msra.mxu0 %v6699_v31  ;;  %2431 = vmatprep.mubr.f32.mxu0 %v5941_v0 }
  0xea   : > { %2346 = vmatmul.mubr.f32.gmra.mxu1 %v6211_v61  ;;  %2635 = vmatprep.subr.mxu0 %v6643_v42 }
  0xeb   : > { %2535 = vmatpush1.msra.mxu1 %v2534_v38  ;;  %2351 = vmatprep.mubr.f32.mxu1 %v5941_v0 }
  0xec   : > { %2437 = vmatmul.mubr.f32.vlgmr.msra.gmra.mxu0 %v6201_v55  ;;  %2541 = vmatprep.subr.mxu1 %v2540_v40 }
  0xed   : > { %2442 = vmatprep.mubr.f32.mxu0 %v5941_v0  ;;  %2547 = vmatpush1.msra.mxu1 %v2546_v18 }
  0xee   : > { %2353 = vmatmul.mubr.f32.gmra.mxu1 %v6213_v62  ;;  %2638 = vmatpush1.msra.mxu0 %v6657_v41 }
  0xef   : > { %2580 = vmatprep.mubr.f32.mxu1 %v5941_v0  ;;  %2747 = vmatprep.subr.mxu1 %v6626_v25 }
  0xf0   : > { %2448 = vmatmul.mubr.f32.gmra.mxu0 %v6218_v1  ;;  %2641 = vmatprep.subr.mxu0 %v6666_v10 }
  0xf1   : > { %2453 = vmatprep.mubr.f32.mxu0 %v5941_v0  ;;  %2644 = vmatpush1.msra.mxu0 %v6683_v51 }
  0xf2   : > { %2582 = vmatmul.mubr.f32.vlgmr.msra.gmra.mxu1 %v6133_v21  ;;  %2647 = vmatprep.subr.mxu0 %v6704_v26 }
  0xf3   : > { %2749 = vmatpush1.msra.mxu1 %v6638_v46  ;;  %2587 = vmatprep.mubr.f32.mxu1 %v5941_v0 }
  0xf4   : > { %2459 = vmatmul.mubr.f32.gmra.mxu0 %v6249_v27  ;;  %2751 = vmatprep.subr.mxu1 %v6645_v45 }
  0xf5   : > { %2464 = vmatprep.mubr.f32.mxu0 %v5941_v0  ;;  %2650 = vmatpush1.msra.mxu0 %v6713_v34 }
  0xf6   : > { %2589 = vmatmul.mubr.f32.gmra.mxu1 %v6165_v35  ;;  %2653 = vmatprep.subr.mxu0 %v6721_v17 }
  0xf7   : > { %2753 = vmatpush1.msra.mxu1 %v6659_v39  ;;  %2594 = vmatprep.mubr.f32.mxu1 %v5941_v0 }
  0xf8   : > { %2470 = vmatmul.mubr.f32.gmra.mxu0 %v6255_v33  ;;  %2755 = vmatprep.subr.mxu1 %v6676_v49 }
  0xf9   : > { %2656 = vmatpush1.msra.mxu0 %v6726_v57  ;;  %2689 = vmatprep.mubr.f32.mxu0 %v5941_v0 }
  0xfa   : > { %2596 = vmatmul.mubr.f32.gmra.mxu1 %v6211_v61  ;;  %2858 = vmatprep.subr.mxu0 %v2502_v32 }
  0xfb   : > { %2757 = vmatpush1.msra.mxu1 %v6685_v12  ;;  %2601 = vmatprep.mubr.f32.mxu1 %v5941_v0 }
  0xfc   : > { %2692 = vmatmul.mubr.f32.vlgmr.msra.gmra.mxu0 %v6155_v29  ;;  %2759 = vmatprep.subr.mxu1 %v6694_v16 }
  0xfd   : > { %2697 = vmatprep.mubr.f32.mxu0 %v5941_v0  ;;  %2761 = vmatpush1.msra.mxu1 %v6699_v31 }
  0xfe   : > { %2603 = vmatmul.mubr.f32.gmra.mxu1 %v6213_v62  ;;  %2862 = vmatpush1.msra.mxu0 %v2508_v22 }
  0xff   : > { %2794 = vmatprep.mubr.f32.mxu1 %v5941_v0  ;;  %2973 = vmatprep.subr.mxu1 %v6626_v25 }
 0x100   : > { %2700 = vmatmul.mubr.f32.gmra.mxu0 %v6186_v43  ;;  %2866 = vmatprep.subr.mxu0 %v2514_v4 }
 0x101   : > { %2705 = vmatprep.mubr.f32.mxu0 %v5941_v0  ;;  %2870 = vmatpush1.msra.mxu0 %v2520_v56 }
 0x102   : > { %2798 = vmatmul.mubr.f32.vlgmr.msra.gmra.mxu1 %v6170_v37  ;;  %2874 = vmatprep.subr.mxu0 %v2526_v50 }
 0x103   : > { %2975 = vmatpush1.msra.mxu1 %v6638_v46  ;;  %2803 = vmatprep.mubr.f32.mxu1 %v5941_v0 }
 0x104   : > { %2708 = vmatmul.mubr.f32.gmra.mxu0 %v6224_v3  ;;  %2977 = vmatprep.subr.mxu1 %v6645_v45 }
 0x105   : > { %2713 = vmatprep.mubr.f32.mxu0 %v5941_v0  ;;  %2878 = vmatpush1.msra.mxu0 %v2532_v11 }
 0x106   : > { %2807 = vmatmul.mubr.f32.gmra.mxu1 %v6195_v52  ;;  %2882 = vmatprep.subr.mxu0 %v2538_v60 }
 0x107   : > { %2979 = vmatpush1.msra.mxu1 %v6659_v39  ;;  %2812 = vmatprep.mubr.f32.mxu1 %v5941_v0 }
 0x108   : > { %2716 = vmatmul.mubr.f32.gmra.mxu0 %v6227_v7  ;;  %2981 = vmatprep.subr.mxu1 %v6676_v49 }
 0x109   : > { %2886 = vmatpush1.msra.mxu0 %v2544_v63  ;;  %2919 = vmatprep.mubr.f32.mxu0 %v5941_v0 }
 0x10a   : > { %2816 = vmatmul.mubr.f32.gmra.mxu1 %v6234_v13 }
 0x10b   : > { %2983 = vmatpush1.msra.mxu1 %v6685_v12  ;;  %2821 = vmatprep.mubr.f32.mxu1 %v5941_v0 }
 0x10c   : > { %2921 = vmatmul.mubr.f32.vlgmr.msra.gmra.mxu0 %v6133_v21  ;;  %2985 = vmatprep.subr.mxu1 %v6694_v16 }
 0x10d   : > { %2926 = vmatprep.mubr.f32.mxu0 %v5941_v0  ;;  %2987 = vmatpush1.msra.mxu1 %v6699_v31 }
 0x10e   : > { %2825 = vmatmul.mubr.f32.gmra.mxu1 %v6238_v14 }
 0x10f   : > { %3020 = vmatprep.mubr.f32.mxu1 %v5941_v0 }
 0x110   : > { %2928 = vmatmul.mubr.f32.gmra.mxu0 %v6165_v35 }
 0x111   : > { %2933 = vmatprep.mubr.f32.mxu0 %v5941_v0 }
 0x112   : > { %3022 = vmatmul.mubr.f32.vlgmr.msra.gmra.mxu1 %v6133_v21 }
 0x113   : > { %3027 = vmatprep.mubr.f32.mxu1 %v5941_v0 }
 0x114   : > { %2935 = vmatmul.mubr.f32.gmra.mxu0 %v6211_v61 }
 0x115   : > { %2940 = vmatprep.mubr.f32.mxu0 %v5941_v0 }
 0x116   : > { %3029 = vmatmul.mubr.f32.gmra.mxu1 %v6165_v35 }
 0x117   : > { %3034 = vmatprep.mubr.f32.mxu1 %v5941_v0 }
 0x118   : > { %2942 = vmatmul.mubr.f32.gmra.mxu0 %v6213_v62 }
 0x119   : > { %3191 = vmatprep.mubr.f32.mxu0 %v5941_v0 }
 0x11a   : > { %3036 = vmatmul.mubr.f32.gmra.mxu1 %v6211_v61 }
 0x11b   : > { %3041 = vmatprep.mubr.f32.mxu1 %v5941_v0 }
 0x11c   : > { %v368_v29 = vpop.f32.mrf.mxu0 }
 0x11e   : > { %v370_v21 = vpop.f32.mrf.mxu0  ;;  %3043 = vmatmul.mubr.f32.gmra.mxu1 %v6213_v62 }
 0x11f   : > { %3318 = vmatprep.mubr.f32.mxu1 %v5941_v0 }
 0x120   : > { %v379_v37 = vpop.f32.mrf.mxu0 }
 0x121   : > { %v513_v52 = vpop.f32.mrf.mxu1 }
 0x122   : > { %v381_v43 = vpop.f32.mrf.mxu0  ;;  %v514_v54 = vadd.f32 %v513_v52, %v368_v29 }
 0x123   : > { %v515_v55 = vpop.f32.mrf.mxu1 }
 0x124   : > { %v390_v35 = vpop.f32.mrf.mxu0  ;;  %v516_v4 = vadd.f32 %v515_v55, %v370_v21 }
 0x125   : > { %v520_v3 = vpop.f32.mrf.mxu1 }
 0x126   : > { %v392_v1 = vpop.f32.mrf.mxu0  ;;  %v521_v53 = vadd.f32 %v520_v3, %v379_v37 }
 0x127   : > { %v522_v13 = vpop.f32.mrf.mxu1 }
 0x128   : > { %v401_v7 = vpop.f32.mrf.mxu0  ;;  %v523_v16 = vadd.f32 %v522_v13, %v381_v43 }
 0x12a   : > { %v403_v14 = vpop.f32.mrf.mxu0  ;;  %v527_v27 = vpop.f32.mrf.mxu1 }
 0x12b   : > { %v528_v34 = vadd.f32 %v527_v27, %v390_v35 }
 0x12c   : > { %v623_v61 = vpop.f32.mrf.mxu0  ;;  %v529_v33 = vpop.f32.mrf.mxu1 }
 0x12d   : > { %v624_v50 = vadd.f32 %v623_v61, %v514_v54  ;;  %v530_v36 = vadd.f32 %v529_v33, %v392_v1 }
 0x12e   : > { %v625_v25 = vpop.f32.mrf.mxu0  ;;  %v534_v44 = vpop.f32.mrf.mxu1 }
 0x12f   : > { %v626_v28 = vadd.f32 %v625_v25, %v516_v4  ;;  %v535_v8 = vadd.f32 %v534_v44, %v401_v7  ;;  %v3114_v7 = vsel %vm276_vm0, %v242_v20, 0 }
 0x130   : > { %v631_v23 = vpop.f32.mrf.mxu0  ;;  %v536_v46 = vpop.f32.mrf.mxu1 }
 0x131   : > { %v632_v56 = vadd.f32 %v631_v23, %v521_v53  ;;  %v537_v38 = vadd.f32 %v536_v46, %v403_v14  ;;  %v243_v23 = vld [vmem:[#allocation7 + $0x8] sm:$0xff] }
 0x132   : > { %v633_v62 = vpop.f32.mrf.mxu0  ;;  %v729_v42 = vpop.f32.mrf.mxu1 }
 0x133   : > { %v634_v47 = vadd.f32 %v633_v62, %v523_v16  ;;  %v730_v9 = vadd.f32 %v729_v42, %v624_v50 }
 0x134   : > { %v639_v45 = vpop.f32.mrf.mxu0  ;;  %v731_v5 = vpop.f32.mrf.mxu1 }
 0x135   : > { %v640_v11 = vadd.f32 %v639_v45, %v528_v34  ;;  %v732_v59 = vadd.f32 %v731_v5, %v626_v28 }
 0x136   : > { %v641_v41 = vpop.f32.mrf.mxu0  ;;  %v738_v39 = vpop.f32.mrf.mxu1 }
 0x137   : > { %v739_v58 = vadd.f32 %v738_v39, %v632_v56  ;;  %v642_v15 = vadd.f32 %v641_v41, %v530_v36 }
 0x138   : > { %v647_v24 = vpop.f32.mrf.mxu0  ;;  %v740_v32 = vpop.f32.mrf.mxu1 }
 0x139   : > { %v741_v60 = vadd.f32 %v740_v32, %v634_v47  ;;  %v648_v43 = vadd.f32 %v647_v24, %v535_v8 }
 0x13a   : > { %v649_v10 = vpop.f32.mrf.mxu0  ;;  %v747_v48 = vpop.f32.mrf.mxu1 }
 0x13b   : > { %v748_v40 = vadd.f32 %v747_v48, %v640_v11  ;;  %v650_v33 = vadd.f32 %v649_v10, %v537_v38  ;;  %v3117_v10 = vsel %vm276_vm0, %v243_v23, 0 }
 0x13c   : > { %v852_v30 = vpop.f32.mrf.mxu0  ;;  %v749_v49 = vpop.f32.mrf.mxu1 }
 0x13d   : > { %v853_v52 = vadd.f32 %v852_v30, %v730_v9  ;;  %v750_v35 = vadd.f32 %v749_v49, %v642_v15 }
 0x13e   : > { %v854_v6 = vpop.f32.mrf.mxu0  ;;  %v756_v22 = vpop.f32.mrf.mxu1 }
 0x13f   : > { %v855_v18 = vadd.f32 %v854_v6, %v732_v59  ;;  %v757_v25 = vadd.f32 %v756_v22, %v648_v43  ;;  %v6864_v6 = vand.u32 4294901760, %v3114_v7 }
 0x140   : > { %v859_v51 = vpop.f32.mrf.mxu0  ;;  %v758_v12 = vpop.f32.mrf.mxu1 }
 0x141   : > { %v860_v19 = vadd.f32 %v859_v51, %v739_v58  ;;  %v759_v5 = vadd.f32 %v758_v12, %v650_v33  ;;  %v6876_v36 = vsub.f32 %v3114_v7, %v6864_v6  ;;  %v6878_v58 = vand.u32 4294901760, %v3117_v10 }
 0x142   : > { %v861_v31 = vpop.f32.mrf.mxu0  ;;  %v953_v26 = vpop.f32.mrf.mxu1 }
 0x143   : > { %v862_v29 = vadd.f32 %v861_v31, %v741_v60  ;;  %v954_v44 = vadd.f32 %v953_v26, %v853_v52 }
 0x144   : > { %v866_v17 = vpop.f32.mrf.mxu0  ;;  %v955_v57 = vpop.f32.mrf.mxu1 }
 0x145   : > { %v867_v1 = vadd.f32 %v866_v17, %v748_v40  ;;  %v956_v3 = vadd.f32 %v955_v57, %v855_v18  ;;  %v3049_v22 = vmul.f32 0.1, %v954_v44 }
 0x146   : > { %v868_v63 = vpop.f32.mrf.mxu0  ;;  %v960_v2 = vpop.f32.mrf.mxu1 }
 0x147   : > { %v961_v55 = vadd.f32 %v960_v2, %v860_v19  ;;  %v869_v14 = vadd.f32 %v868_v63, %v750_v35  ;;  %v3050_v32 = vmul.f32 0.1, %v956_v3  ;;  %v3081_v11 = vmax.f32 %v954_v44, %v3049_v22 }
 0x148   : > { %v873_v21 = vpop.f32.mrf.mxu0  ;;  %v962_v37 = vpop.f32.mrf.mxu1 }
 0x149   : > { %v963_v13 = vadd.f32 %v962_v37, %v862_v29  ;;  %v3057_v41 = vmul.f32 0.1, %v961_v55  ;;  %v874_v39 = vadd.f32 %v873_v21, %v757_v25  ;;  %v3082_v47 = vmax.f32 %v956_v3, %v3050_v32 }
 0x14a   : > { %v875_v27 = vpop.f32.mrf.mxu0  ;;  %v967_v61 = vpop.f32.mrf.mxu1  ;;  %v6905_v37 = vand.u32 4294901760, %v6876_v36  ;;  %v6907_v43 = vand.u32 4294901760, %v3081_v11 }
 0x14b   : > { %v3058_v46 = vmul.f32 0.1, %v963_v13  ;;  %v968_v62 = vadd.f32 %v967_v61, %v867_v1  ;;  %v876_v51 = vadd.f32 %v875_v27, %v759_v5  ;;  %v3089_v54 = vmax.f32 %v961_v55, %v3057_v41 }
 0x14c   : > { %v6860_v42 = vpop.f32.mrf.mxu0  ;;  %v969_v45 = vpop.f32.mrf.mxu1  ;;  %v6895_v40 = vand.u32 4294901760, %v3082_v47  ;;  %v6915_v55 = vsub.f32 %v3117_v10, %v6878_v58 }
 0x14d   : > { %v970_v24 = vadd.f32 %v969_v45, %v869_v14  ;;  %v3065_v48 = vmul.f32 0.1, %v968_v62  ;;  %v3090_v16 = vmax.f32 %v963_v13, %v3058_v46  ;;  %v6888_v15 = vand.u32 4294901760, %v3089_v54 }
 0x14e   : > { %v6862_v30 = vpop.f32.mrf.mxu0  ;;  %v974_v49 = vpop.f32.mrf.mxu1  ;;  %v6934_v25 = vsub.f32 %v3082_v47, %v6895_v40  ;;  %v3195_v46 = vsub.f32 %v6876_v36, %v6905_v37  ;;  %v6950_v5 = vand.u32 4294901760, %v6915_v55 }
 0x14f   : > { %v3066_v53 = vmul.f32 0.1, %v970_v24  ;;  %v975_v4 = vadd.f32 %v974_v49, %v874_v39  ;;  %v3097_v31 = vmax.f32 %v968_v62, %v3065_v48  ;;  %v6882_v2 = vand.u32 4294901760, %v3090_v16 }
 0x150   : > { %v6867_v26 = vpop.f32.mrf.mxu0  ;;  %v976_v12 = vpop.f32.mrf.mxu1  ;;  %v6925_v27 = vsub.f32 %v3089_v54, %v6888_v15  ;;  %v6945_v62 = vsub.f32 %v3081_v11, %v6907_v43  ;;  %v3206_v54 = vsub.f32 %v6915_v55, %v6950_v5 }
 0x151   : > { %v3098_v56 = vmax.f32 %v970_v24, %v3066_v53  ;;  %v3073_v34 = vmul.f32 0.1, %v975_v4  ;;  %v977_v28 = vadd.f32 %v976_v12, %v876_v51  ;;  %v6869_v17 = vand.u32 4294901760, %v3097_v31 }
 0x152   : > { %v6871_v57 = vpop.f32.mrf.mxu0  ;;  %v6873_v50 = vpop.f32.mrf.mxu1  ;;  %v6918_v1 = vsub.f32 %v3090_v16, %v6882_v2  ;;  %v7738_v48 = vand.u32 4294901760, %v6925_v27  ;;  %v6974_v53 = vand.u32 4294901760, %v3195_v46  ;;  %v7740_v16 = vand.u32 4294901760, %v6934_v25 }
 0x153   : > { %v6880_v59 = vand.u32 4294901760, %v3098_v56  ;;  %v3105_v60 = vmax.f32 %v975_v4, %v3073_v34  ;;  %v3074_v63 = vmul.f32 0.1, %v977_v28  ;;  %v6898_v18 = vsub.f32 %v3097_v31, %v6869_v17 }
 0x154   : > { %v6884_v8 = vpop.f32.mrf.mxu0  ;;  %v6886_v9 = vpop.f32.mrf.mxu1  ;;  %v3264_v32 = vand.u32 4294901760, %v6918_v1  ;;  %v7739_v31 = vand.u32 4294901760, %v6945_v62 }
 0x155   : > { %v6891_v19 = vsub.f32 %v3098_v56, %v6880_v59  ;;  %v6893_v20 = vand.u32 4294901760, %v3105_v60  ;;  %v3106_v38 = vmax.f32 %v977_v28, %v3074_v63  ;;  %v3258_v44 = vand.u32 4294901760, %v6898_v18 }
 0x156   : > { %v6900_v29 = vpop.f32.mrf.mxu0  ;;  %v6902_v21 = vpop.f32.mrf.mxu1  ;;  %v3265_v47 = vsub.f32 %v6918_v1, %v3264_v32 }
 0x157   : > { %v6910_v52 = vsub.f32 %v3105_v60, %v6893_v20  ;;  %v6912_v35 = vand.u32 4294901760, %v3106_v38  ;;  %v3252_v33 = vand.u32 4294901760, %v6891_v19  ;;  %v3259_v4 = vsub.f32 %v6898_v18, %v3258_v44 }
 0x158   : > { %v6920_v3 = vpop.f32.mrf.mxu0  ;;  %v6922_v13 = vpop.f32.mrf.mxu1  ;;  %v3271_v60 = vsub.f32 %v6925_v27, %v7738_v48 }
 0x159   : > { %v3246_v61 = vand.u32 4294901760, %v6910_v52  ;;  %v6929_v7 = vsub.f32 %v3106_v38, %v6912_v35  ;;  %3144 = vmatprep.subr.mxu0 %v6912_v35  ;;  %v3253_v10 = vsub.f32 %v6891_v19, %v3252_v33  ;;  %v3260_v46 = vand.u32 4294901760, %v3259_v4 }
 0x15a   : > { %v6937_v14 = vpop.f32.mrf.mxu0  ;;  %v6939_v23 = vpop.f32.mrf.mxu1  ;;  %3146 = vmatpush1.msra.mxu0 %v6893_v20  ;;  %v3266_v4 = vand.u32 4294901760, %v3265_v47 }
 0x15b   : > { %3148 = vmatprep.subr.mxu0 %v6880_v59  ;;  %v3240_v45 = vand.u32 4294901760, %v6929_v7  ;;  %v3247_v24 = vsub.f32 %v6910_v52, %v3246_v61  ;;  %v3254_v11 = vand.u32 4294901760, %v3253_v10  ;;  %v3283_v10 = vsub.f32 %v6945_v62, %v7739_v31 }
 0x15c   : > { %v6952_v41 = vpop.f32.mrf.mxu0  ;;  %v6954_v39 = vpop.f32.mrf.mxu1  ;;  %3150 = vmatpush1.msra.mxu0 %v6869_v17 }
 0x15d   : > { %3152 = vmatprep.subr.mxu0 %v6882_v2  ;;  %v3241_v49 = vsub.f32 %v6929_v7, %v3240_v45  ;;  %v3248_v28 = vand.u32 4294901760, %v3247_v24  ;;  %v3277_v24 = vsub.f32 %v6934_v25, %v7740_v16  ;;  %v3284_v16 = vand.u32 4294901760, %v3283_v10 }
 0x15e   : > { %v6969_v22 = vpop.f32.mrf.mxu0  ;;  %v6971_v51 = vpop.f32.mrf.mxu1  ;;  %3154 = vmatpush1.msra.mxu0 %v6888_v15 }
 0x15f   : > { %3156 = vmatprep.subr.mxu0 %v6895_v40  ;;  %v3242_v12 = vand.u32 4294901760, %v3241_v49  ;;  %v7005_v49 = vand.u32 4294901760, %v3206_v54  ;;  %v3278_v31 = vand.u32 4294901760, %v3277_v24 }
 0x160   : > { %v6984_v56 = vpop.f32.mrf.mxu0  ;;  %v6986_v34 = vpop.f32.mrf.mxu1  ;;  %3158 = vmatpush1.msra.mxu0 %v6907_v43 }
 0x161   : > { %3243 = vmatprep.subr.mxu1 %v3242_v12  ;;  %3359 = vmatprep.subr.mxu0 %v6929_v7  ;;  %v1204_v7 = vadd.f32 %v6873_v50, %v6860_v42  ;;  %v1213_v42 = vadd.f32 %v6922_v13, %v6871_v57  ;;  %v1218_v50 = vadd.f32 %v6939_v23, %v6884_v8  ;;  %v7756_v57 = vand.u32 4294901760, %v6934_v25 }
 0x162   : > { %v6996_v63 = vpop.f32.mrf.mxu0  ;;  %v6998_v38 = vpop.f32.mrf.mxu1  ;;  %3197 = vmatmul.mubr.f32.vlgmr.msra.gmra.mxu0 %v6974_v53  ;;  %3249 = vmatpush1.msra.mxu1 %v3248_v28  ;;  %v3272_v28 = vand.u32 4294901760, %v3271_v60  ;;  %v1225_v8 = vadd.f32 %v6971_v51, %v6920_v3  ;;  %v1227_v13 = vadd.f32 %v6986_v34, %v6937_v14 }
 0x163   : > { %3362 = vmatpush1.msra.mxu0 %v6910_v52  ;;  %3255 = vmatprep.subr.mxu1 %v3254_v11 }
 0x164   : > { %v7010_v12 = vpop.f32.mrf.mxu0  ;;  %3365 = vmatprep.subr.mxu0 %v6891_v19  ;;  %v7013_v48 = vpop.f32.mrf.mxu1  ;;  %3261 = vmatpush1.msra.mxu1 %v3260_v46  ;;  %v1206_v19 = vadd.f32 %v6886_v9, %v6862_v30  ;;  %v7755_v30 = vand.u32 4294901760, %v6925_v27 }
 0x165   : > { %3368 = vmatpush1.msra.mxu0 %v6898_v18  ;;  %3202 = vmatprep.mubr.f32.mxu0 %v5941_v0  ;;  %v1314_v18 = vadd.f32 %v6952_v41, %v1204_v7 }
 0x166   : > { %v7017_v11 = vpop.f32.mrf.mxu0  ;;  %3267 = vmatprep.subr.mxu1 %v3266_v4  ;;  %3371 = vmatprep.subr.mxu0 %v6918_v1  ;;  %v1428_v54 = vpop.f32.mrf.mxu1  ;;  %v1316_v1 = vadd.f32 %v6969_v22, %v1206_v19 }
 0x167   : > { %3208 = vmatmul.mubr.f32.gmra.mxu0 %v7005_v49  ;;  %3273 = vmatpush1.msra.mxu1 %v3272_v28  ;;  %v1420_v41 = vadd.f32 %v6998_v38, %v1314_v18 }
 0x168   : > { %3374 = vmatpush1.msra.mxu0 %v6925_v27  ;;  %v7022_v46 = vpop.f32.mrf.mxu0  ;;  %3279 = vmatprep.subr.mxu1 %v3278_v31  ;;  %v1430_v47 = vpop.f32.mrf.mxu1  ;;  %v1324_v27 = vadd.f32 %v6996_v63, %v1213_v42  ;;  %v1422_v3 = vadd.f32 %v7013_v48, %v1316_v1 }
 0x169   : > { %3377 = vmatprep.subr.mxu0 %v6934_v25  ;;  %3285 = vmatpush1.msra.mxu1 %v3284_v16  ;;  %v1330_v25 = vadd.f32 %v7010_v12, %v1218_v50  ;;  %v1338_v51 = vadd.f32 %v7022_v46, %v1225_v8 }
 0x16a   : > { %3380 = vmatpush1.msra.mxu0 %v6945_v62  ;;  %v1339_v60 = vpop.f32.mrf.mxu0  ;;  %3413 = vmatprep.mubr.f32.mxu0 %v5941_v0  ;;  %v1437_v4 = vpop.f32.mrf.mxu1 }
 0x16b   : > { %3455 = vmatprep.subr.mxu1 %v6912_v35  ;;  %3548 = vmatprep.subr.mxu0 %v3240_v45 }
 0x16c   : > { %3320 = vmatmul.mubr.f32.vlgmr.msra.gmra.mxu1 %v6864_v6  ;;  %3416 = vmatmul.mubr.f32.vlgmr.msra.gmra.mxu0 %v6876_v36  ;;  %v1542_v31 = vpop.f32.mrf.mxu0  ;;  %v1439_v24 = vpop.f32.mrf.mxu1 }
 0x16d   : > { %3457 = vmatpush1.msra.mxu1 %v6893_v20  ;;  %3552 = vmatpush1.msra.mxu0 %v3246_v61  ;;  %v1543_v28 = vadd.f32 %v1542_v31, %v1420_v41 }
 0x16e   : > { %3459 = vmatprep.subr.mxu1 %v6880_v59  ;;  %3556 = vmatprep.subr.mxu0 %v3252_v33  ;;  %v1544_v16 = vpop.f32.mrf.mxu0  ;;  %v7038_v10 = vpop.f32.mrf.mxu1  ;;  %v1211_v33 = vadd.f32 %v6902_v21, %v6867_v26  ;;  %v1220_v21 = vadd.f32 %v6954_v39, %v6900_v29  ;;  %v7757_v29 = vand.u32 4294901760, %v6945_v62 }
 0x16f   : > { %3461 = vmatpush1.msra.mxu1 %v6869_v17  ;;  %3560 = vmatpush1.msra.mxu0 %v3258_v44  ;;  %v1545_v63 = vadd.f32 %v1544_v16, %v1422_v3 }
 0x170   : > { %3325 = vmatprep.mubr.f32.mxu1 %v5941_v0  ;;  %3463 = vmatprep.subr.mxu1 %v6882_v2  ;;  %v1549_v52 = vpop.f32.mrf.mxu0  ;;  %v7047_v61 = vpop.f32.mrf.mxu1  ;;  %v1322_v44 = vadd.f32 %v6984_v56, %v1211_v33  ;;  %v1332_v14 = vadd.f32 %v7017_v11, %v1220_v21  ;;  %v1340_v56 = vadd.f32 %v1339_v60, %v1227_v13 }
 0x171   : > { %3564 = vmatprep.subr.mxu0 %v3264_v32  ;;  %3327 = vmatmul.mubr.f32.gmra.mxu1 %v6878_v58  ;;  %v1431_v32 = vadd.f32 %v1430_v47, %v1324_v27 }
 0x172   : > { %3465 = vmatpush1.msra.mxu1 %v6888_v15  ;;  %3568 = vmatpush1.msra.mxu0 %v7755_v30  ;;  %v1551_v9 = vpop.f32.mrf.mxu0  ;;  %v1643_v26 = vpop.f32.mrf.mxu1  ;;  %v1429_v39 = vadd.f32 %v1428_v54, %v1322_v44  ;;  %v1440_v11 = vadd.f32 %v1439_v24, %v1332_v14 }
 0x173   : > { %3467 = vmatprep.subr.mxu1 %v6895_v40  ;;  %3572 = vmatprep.subr.mxu0 %v7756_v57  ;;  %v1552_v48 = vadd.f32 %v1551_v9, %v1431_v32  ;;  %v1644_v16 = vadd.f32 %v1643_v26, %v1543_v28 }
 0x174   : > { %3469 = vmatpush1.msra.mxu1 %v6907_v43  ;;  %3576 = vmatpush1.msra.mxu0 %v7757_v29  ;;  %v1556_v23 = vpop.f32.mrf.mxu0  ;;  %v1645_v45 = vpop.f32.mrf.mxu1  ;;  %v1550_v34 = vadd.f32 %v1549_v52, %v1429_v39  ;;  %v1449_v52 = vadd.f32 %v7047_v61, %v1340_v56 }
 0x175   : > { %3502 = vmatprep.mubr.f32.mxu1 %v5941_v0  ;;  %3649 = vmatprep.subr.mxu1 %v6912_v35  ;;  %v1438_v35 = vadd.f32 %v1437_v4, %v1330_v25  ;;  %v3051_v18 = vmul.f32 0.1, %v1644_v16 }
 0x176   : > { %3506 = vmatmul.mubr.f32.vlgmr.msra.gmra.mxu1 %v6905_v37  ;;  %v1558_v62 = vpop.f32.mrf.mxu0  ;;  %v1650_v22 = vpop.f32.mrf.mxu1  ;;  %3421 = vmatprep.mubr.f32.mxu0 %v5941_v0 }
 0x177   : > { %3651 = vmatpush1.msra.mxu1 %v6893_v20  ;;  %3424 = vmatmul.mubr.f32.gmra.mxu0 %v6915_v55  ;;  %v1651_v54 = vadd.f32 %v1650_v22, %v1550_v34  ;;  %v1557_v46 = vadd.f32 %v1556_v23, %v1438_v35  ;;  %v1646_v20 = vadd.f32 %v1645_v45, %v1545_v63 }
 0x178   : > { %3653 = vmatprep.subr.mxu1 %v6880_v59  ;;  %v1563_v38 = vpop.f32.mrf.mxu0  ;;  %v1652_v12 = vpop.f32.mrf.mxu1  ;;  %3609 = vmatprep.mubr.f32.mxu0 %v5941_v0  ;;  %v1447_v59 = vadd.f32 %v7038_v10, %v1338_v51  ;;  %v1559_v7 = vadd.f32 %v1558_v62, %v1440_v11  ;;  %v3083_v41 = vmax.f32 %v1644_v16, %v3051_v18 }
 0x179   : > { %3655 = vmatpush1.msra.mxu1 %v6869_v17  ;;  %3511 = vmatprep.mubr.f32.mxu1 %v5941_v0  ;;  %v1653_v47 = vadd.f32 %v1652_v12, %v1552_v48  ;;  %v3059_v19 = vmul.f32 0.1, %v1651_v54 }
 0x17a   : > { %3657 = vmatprep.subr.mxu1 %v6882_v2  ;;  %v1565_v60 = vpop.f32.mrf.mxu0  ;;  %v1657_v4 = vpop.f32.mrf.mxu1  ;;  %3515 = vmatmul.mubr.f32.gmra.mxu1 %v6950_v5  ;;  %v1564_v33 = vadd.f32 %v1563_v38, %v1447_v59  ;;  %v7146_v12 = vand.u32 4294901760, %v3083_v41 }
 0x17b   : > { %3659 = vmatpush1.msra.mxu1 %v6888_v15  ;;  %3611 = vmatmul.mubr.f32.vlgmr.msra.gmra.mxu0 %v6864_v6  ;;  %v3060_v17 = vmul.f32 0.1, %v1653_v47  ;;  %v1658_v31 = vadd.f32 %v1657_v4, %v1557_v46  ;;  %v3052_v15 = vmul.f32 0.1, %v1646_v20  ;;  %v1566_v30 = vadd.f32 %v1565_v60, %v1449_v52 }
 0x17c   : > { %3661 = vmatprep.subr.mxu1 %v6895_v40  ;;  %v7100_v24 = vpop.f32.mrf.mxu0  ;;  %v1659_v2 = vpop.f32.mrf.mxu1  ;;  %3616 = vmatprep.mubr.f32.mxu0 %v5941_v0  ;;  %v3091_v44 = vmax.f32 %v1651_v54, %v3059_v19 }
 0x17d   : > { %3663 = vmatpush1.msra.mxu1 %v6907_v43  ;;  %v1660_v10 = vadd.f32 %v1659_v2, %v1559_v7  ;;  %3696 = vmatprep.mubr.f32.mxu1 %v5941_v0  ;;  %v3067_v42 = vmul.f32 0.1, %v1658_v31  ;;  %v3092_v61 = vmax.f32 %v1653_v47, %v3060_v17  ;;  %v3084_v27 = vmax.f32 %v1646_v20, %v3052_v15 }
 0x17e   : > { %v7106_v50 = vpop.f32.mrf.mxu0  ;;  %v1664_v40 = vpop.f32.mrf.mxu1  ;;  %3698 = vmatmul.mubr.f32.vlgmr.msra.gmra.mxu1 %v6864_v6  ;;  %v7130_v22 = vand.u32 4294901760, %v3091_v44  ;;  %v7179_v2 = vsub.f32 %v3083_v41, %v7146_v12 }
 0x17f   : > { %v3068_v9 = vmul.f32 0.1, %v1660_v10  ;;  %v1665_v26 = vadd.f32 %v1664_v40, %v1564_v33  ;;  %3618 = vmatmul.mubr.f32.gmra.mxu0 %v6878_v58  ;;  %3703 = vmatprep.mubr.f32.mxu1 %v5941_v0  ;;  %v3099_v43 = vmax.f32 %v1658_v31, %v3067_v42  ;;  %v7124_v14 = vand.u32 4294901760, %v3092_v61 }
 0x180   : > { %v7111_v21 = vpop.f32.mrf.mxu0  ;;  %v1666_v1 = vpop.f32.mrf.mxu1  ;;  %3783 = vmatprep.mubr.f32.mxu0 %v5941_v0  ;;  %v7137_v35 = vand.u32 4294901760, %v3084_v27  ;;  %v7161_v47 = vsub.f32 %v3091_v44, %v7130_v22 }
 0x181   : > { %v3100_v57 = vmax.f32 %v1660_v10, %v3068_v9  ;;  %v3075_v8 = vmul.f32 0.1, %v1665_v26  ;;  %v1667_v13 = vadd.f32 %v1666_v1, %v1566_v30  ;;  %v7114_v29 = vand.u32 4294901760, %v3099_v43 }
 0x182   : > { %v7116_v23 = vpop.f32.mrf.mxu0  ;;  %v7118_v45 = vpop.f32.mrf.mxu1  ;;  %3705 = vmatmul.mubr.f32.gmra.mxu1 %v6878_v58  ;;  %v7154_v54 = vsub.f32 %v3092_v61, %v7124_v14  ;;  %v7170_v16 = vsub.f32 %v3084_v27, %v7137_v35  ;;  %v3862_v42 = vand.u32 4294901760, %v7161_v47 }
 0x183   : > { %v7121_v25 = vand.u32 4294901760, %v3100_v57  ;;  %v3107_v39 = vmax.f32 %v1665_v26, %v3075_v8  ;;  %v3076_v3 = vmul.f32 0.1, %v1667_v13  ;;  %3910 = vmatprep.mubr.f32.mxu1 %v5941_v0  ;;  %v7140_v63 = vsub.f32 %v3099_v43, %v7114_v29 }
 0x184   : > { %v7126_v32 = vpop.f32.mrf.mxu0  ;;  %v7128_v62 = vpop.f32.mrf.mxu1  ;;  %v3856_v15 = vand.u32 4294901760, %v7154_v54  ;;  %v7742_v61 = vand.u32 4294901760, %v7170_v16  ;;  %v7741_v43 = vand.u32 4294901760, %v7179_v2  ;;  %v3863_v41 = vsub.f32 %v7161_v47, %v3862_v42 }
 0x185   : > { %v7133_v51 = vsub.f32 %v3100_v57, %v7121_v25  ;;  %v7135_v56 = vand.u32 4294901760, %v3107_v39  ;;  %v3108_v34 = vmax.f32 %v1667_v13, %v3076_v3  ;;  %v3850_v7 = vand.u32 4294901760, %v7140_v63 }
 0x186   : > { %v7142_v48 = vpop.f32.mrf.mxu0  ;;  %v7144_v38 = vpop.f32.mrf.mxu1  ;;  %v3857_v13 = vsub.f32 %v7154_v54, %v3856_v15 }
 0x187   : > { %v7149_v28 = vsub.f32 %v3107_v39, %v7135_v56  ;;  %v7151_v11 = vand.u32 4294901760, %v3108_v34  ;;  %v3844_v59 = vand.u32 4294901760, %v7133_v51  ;;  %v3851_v26 = vsub.f32 %v7140_v63, %v3850_v7 }
 0x188   : > { %v7156_v46 = vpop.f32.mrf.mxu0  ;;  %v7158_v20 = vpop.f32.mrf.mxu1 }
 0x189   : > { %v3838_v60 = vand.u32 4294901760, %v7149_v28  ;;  %v7165_v4 = vsub.f32 %v3108_v34, %v7151_v11  ;;  %3736 = vmatprep.subr.mxu0 %v7151_v11  ;;  %v3845_v18 = vsub.f32 %v7133_v51, %v3844_v59  ;;  %v3852_v34 = vand.u32 4294901760, %v3851_v26 }
 0x18a   : > { %v7173_v17 = vpop.f32.mrf.mxu0  ;;  %v7175_v31 = vpop.f32.mrf.mxu1  ;;  %3738 = vmatpush1.msra.mxu0 %v7135_v56  ;;  %v3864_v26 = vand.u32 4294901760, %v3863_v41 }
 0x18b   : > { %3740 = vmatprep.subr.mxu0 %v7121_v25  ;;  %v3832_v52 = vand.u32 4294901760, %v7165_v4  ;;  %v3839_v10 = vsub.f32 %v7149_v28, %v3838_v60  ;;  %v3846_v27 = vand.u32 4294901760, %v3845_v18 }
 0x18c   : > { %v7183_v19 = vpop.f32.mrf.mxu0  ;;  %v7185_v33 = vpop.f32.mrf.mxu1  ;;  %3742 = vmatpush1.msra.mxu0 %v7114_v29 }
 0x18d   : > { %3744 = vmatprep.subr.mxu0 %v7124_v14  ;;  %v3833_v40 = vsub.f32 %v7165_v4, %v3832_v52  ;;  %v3840_v8 = vand.u32 4294901760, %v3839_v10  ;;  %v3869_v10 = vsub.f32 %v7170_v16, %v7742_v61 }
 0x18e   : > { %v7198_v30 = vpop.f32.mrf.mxu0  ;;  %v7200_v9 = vpop.f32.mrf.mxu1  ;;  %3746 = vmatpush1.msra.mxu0 %v7130_v22 }
 0x18f   : > { %3748 = vmatprep.subr.mxu0 %v7137_v35  ;;  %v3834_v1 = vand.u32 4294901760, %v3833_v40 }
 0x190   : > { %v7209_v44 = vpop.f32.mrf.mxu0  ;;  %v7211_v57 = vpop.f32.mrf.mxu1  ;;  %3750 = vmatpush1.msra.mxu0 %v7146_v12 }
 0x191   : > { %3835 = vmatprep.subr.mxu1 %v3834_v1  ;;  %3951 = vmatprep.subr.mxu0 %v7165_v4  ;;  %v3875_v4 = vsub.f32 %v7179_v2, %v7741_v43  ;;  %v3858_v1 = vand.u32 4294901760, %v3857_v13  ;;  %v3870_v43 = vand.u32 4294901760, %v3869_v10 }
 0x192   : > { %v7221_v39 = vpop.f32.mrf.mxu0  ;;  %v7223_v3 = vpop.f32.mrf.mxu1  ;;  %3789 = vmatmul.mubr.f32.vlgmr.msra.gmra.mxu0 %v6974_v53  ;;  %3841 = vmatpush1.msra.mxu1 %v3840_v8 }
 0x193   : > { %3954 = vmatpush1.msra.mxu0 %v7149_v28  ;;  %3847 = vmatprep.subr.mxu1 %v3846_v27  ;;  %v3876_v61 = vand.u32 4294901760, %v3875_v4 }
 0x194   : > { %v7233_v40 = vpop.f32.mrf.mxu0  ;;  %3957 = vmatprep.subr.mxu0 %v7133_v51  ;;  %v7236_v18 = vpop.f32.mrf.mxu1  ;;  %3853 = vmatpush1.msra.mxu1 %v3852_v34  ;;  %v1896_v51 = vadd.f32 %v7128_v62, %v7106_v50  ;;  %v1910_v62 = vadd.f32 %v7185_v33, %v7142_v48  ;;  %v7759_v48 = vand.u32 4294901760, %v7179_v2 }
 0x195   : > { %3960 = vmatpush1.msra.mxu0 %v7140_v63  ;;  %3794 = vmatprep.mubr.f32.mxu0 %v5941_v0 }
 0x196   : > { %v7240_v8 = vpop.f32.mrf.mxu0  ;;  %3859 = vmatprep.subr.mxu1 %v3858_v1  ;;  %3963 = vmatprep.subr.mxu0 %v7154_v54  ;;  %v2118_v27 = vpop.f32.mrf.mxu1 }
 0x197   : > { %3800 = vmatmul.mubr.f32.gmra.mxu0 %v7005_v49  ;;  %3865 = vmatpush1.msra.mxu1 %v3864_v26 }
 0x198   : > { %3966 = vmatpush1.msra.mxu0 %v7161_v47  ;;  %v7245_v34 = vpop.f32.mrf.mxu0  ;;  %3871 = vmatprep.subr.mxu1 %v3870_v43  ;;  %v2120_v13 = vpop.f32.mrf.mxu1 }
 0x199   : > { %3969 = vmatprep.subr.mxu0 %v7170_v16  ;;  %3877 = vmatpush1.msra.mxu1 %v3876_v61 }
 0x19a   : > { %3972 = vmatpush1.msra.mxu0 %v7179_v2  ;;  %v2029_v41 = vpop.f32.mrf.mxu0  ;;  %4005 = vmatprep.mubr.f32.mxu0 %v5941_v0  ;;  %v2127_v1 = vpop.f32.mrf.mxu1 }
 0x19b   : > { %4047 = vmatprep.subr.mxu1 %v7151_v11  ;;  %4140 = vmatprep.subr.mxu0 %v3832_v52  ;;  %v1894_v52 = vadd.f32 %v7118_v45, %v7100_v24  ;;  %v1903_v24 = vadd.f32 %v7158_v20, %v7116_v23  ;;  %v1908_v45 = vadd.f32 %v7175_v31, %v7126_v32  ;;  %v7758_v23 = vand.u32 4294901760, %v7170_v16 }
 0x19c   : > { %3912 = vmatmul.mubr.f32.vlgmr.msra.gmra.mxu1 %v6864_v6  ;;  %4008 = vmatmul.mubr.f32.vlgmr.msra.gmra.mxu0 %v6876_v36  ;;  %v2232_v10 = vpop.f32.mrf.mxu0  ;;  %v2129_v4 = vpop.f32.mrf.mxu1  ;;  %v1915_v32 = vadd.f32 %v7200_v9, %v7156_v46  ;;  %v1917_v20 = vadd.f32 %v7211_v57, %v7173_v17  ;;  %v2022_v17 = vadd.f32 %v7240_v8, %v1910_v62 }
 0x19d   : > { %4049 = vmatpush1.msra.mxu1 %v7135_v56  ;;  %4144 = vmatpush1.msra.mxu0 %v3838_v60  ;;  %v2004_v63 = vadd.f32 %v7183_v19, %v1894_v52  ;;  %v2014_v47 = vadd.f32 %v7221_v39, %v1903_v24  ;;  %v2020_v16 = vadd.f32 %v7233_v40, %v1908_v45 }
 0x19e   : > { %4051 = vmatprep.subr.mxu1 %v7121_v25  ;;  %4148 = vmatprep.subr.mxu0 %v3844_v59  ;;  %v2234_v61 = vpop.f32.mrf.mxu0  ;;  %v7259_v43 = vpop.f32.mrf.mxu1  ;;  %v1901_v59 = vadd.f32 %v7144_v38, %v7111_v21  ;;  %v2006_v38 = vadd.f32 %v7198_v30, %v1896_v51  ;;  %v2028_v30 = vadd.f32 %v7245_v34, %v1915_v32 }
 0x19f   : > { %4053 = vmatpush1.msra.mxu1 %v7114_v29  ;;  %4152 = vmatpush1.msra.mxu0 %v3850_v7  ;;  %v2110_v19 = vadd.f32 %v7223_v3, %v2004_v63  ;;  %v2030_v9 = vadd.f32 %v2029_v41, %v1917_v20  ;;  %v2130_v26 = vadd.f32 %v2129_v4, %v2022_v17 }
 0x1a0   : > { %3917 = vmatprep.mubr.f32.mxu1 %v5941_v0  ;;  %4055 = vmatprep.subr.mxu1 %v7124_v14  ;;  %v2239_v28 = vpop.f32.mrf.mxu0  ;;  %v7268_v60 = vpop.f32.mrf.mxu1  ;;  %v2012_v54 = vadd.f32 %v7209_v44, %v1901_v59  ;;  %v2112_v46 = vadd.f32 %v7236_v18, %v2006_v38 }
 0x1a1   : > { %4156 = vmatprep.subr.mxu0 %v3856_v15  ;;  %3919 = vmatmul.mubr.f32.gmra.mxu1 %v6878_v58  ;;  %v2121_v15 = vadd.f32 %v2120_v13, %v2014_v47  ;;  %v2233_v18 = vadd.f32 %v2232_v10, %v2110_v19  ;;  %v2139_v52 = vadd.f32 %v7268_v60, %v2030_v9 }
 0x1a2   : > { %4057 = vmatpush1.msra.mxu1 %v7130_v22  ;;  %4160 = vmatpush1.msra.mxu0 %v3862_v42  ;;  %v2241_v50 = vpop.f32.mrf.mxu0  ;;  %v2333_v21 = vpop.f32.mrf.mxu1  ;;  %v2119_v33 = vadd.f32 %v2118_v27, %v2012_v54  ;;  %v2235_v57 = vadd.f32 %v2234_v61, %v2112_v46 }
 0x1a3   : > { %4059 = vmatprep.subr.mxu1 %v7137_v35  ;;  %4164 = vmatprep.subr.mxu0 %v7758_v23  ;;  %v2242_v39 = vadd.f32 %v2241_v50, %v2121_v15 }
 0x1a4   : > { %4061 = vmatpush1.msra.mxu1 %v7146_v12  ;;  %4168 = vmatpush1.msra.mxu0 %v7759_v48  ;;  %v2246_v7 = vpop.f32.mrf.mxu0  ;;  %v2335_v31 = vpop.f32.mrf.mxu1  ;;  %v2240_v44 = vadd.f32 %v2239_v28, %v2119_v33 }
 0x1a5   : > { %4094 = vmatprep.mubr.f32.mxu1 %v5941_v0  ;;  %4241 = vmatprep.subr.mxu1 %v7151_v11  ;;  %v2128_v11 = vadd.f32 %v2127_v1, %v2020_v16  ;;  %v2334_v1 = vadd.f32 %v2333_v21, %v2233_v18 }
 0x1a6   : > { %4098 = vmatmul.mubr.f32.vlgmr.msra.gmra.mxu1 %v6905_v37  ;;  %v2248_v2 = vpop.f32.mrf.mxu0  ;;  %v2340_v42 = vpop.f32.mrf.mxu1  ;;  %4013 = vmatprep.mubr.f32.mxu0 %v5941_v0 }
 0x1a7   : > { %4243 = vmatpush1.msra.mxu1 %v7135_v56  ;;  %4016 = vmatmul.mubr.f32.gmra.mxu0 %v6915_v55  ;;  %v2341_v8 = vadd.f32 %v2340_v42, %v2240_v44  ;;  %v2247_v27 = vadd.f32 %v2246_v7, %v2128_v11  ;;  %v2336_v56 = vadd.f32 %v2335_v31, %v2235_v57  ;;  %v3053_v45 = vmul.f32 0.1, %v2334_v1 }
 0x1a8   : > { %4245 = vmatprep.subr.mxu1 %v7121_v25  ;;  %v2253_v3 = vpop.f32.mrf.mxu0  ;;  %v2342_v40 = vpop.f32.mrf.mxu1  ;;  %4201 = vmatprep.mubr.f32.mxu0 %v5941_v0  ;;  %v2137_v25 = vadd.f32 %v7259_v43, %v2028_v30  ;;  %v2249_v61 = vadd.f32 %v2248_v2, %v2130_v26 }
 0x1a9   : > { %4247 = vmatpush1.msra.mxu1 %v7114_v29  ;;  %4103 = vmatprep.mubr.f32.mxu1 %v5941_v0  ;;  %v2343_v34 = vadd.f32 %v2342_v40, %v2242_v39  ;;  %v3061_v28 = vmul.f32 0.1, %v2341_v8  ;;  %v3085_v19 = vmax.f32 %v2334_v1, %v3053_v45 }
 0x1aa   : > { %4249 = vmatprep.subr.mxu1 %v7124_v14  ;;  %v2255_v13 = vpop.f32.mrf.mxu0  ;;  %v2347_v41 = vpop.f32.mrf.mxu1  ;;  %4107 = vmatmul.mubr.f32.gmra.mxu1 %v6950_v5  ;;  %v2254_v51 = vadd.f32 %v2253_v3, %v2137_v25 }
 0x1ab   : > { %4251 = vmatpush1.msra.mxu1 %v7130_v22  ;;  %4203 = vmatmul.mubr.f32.vlgmr.msra.gmra.mxu0 %v6864_v6  ;;  %v3062_v29 = vmul.f32 0.1, %v2343_v34  ;;  %v2348_v10 = vadd.f32 %v2347_v41, %v2247_v27  ;;  %v3054_v22 = vmul.f32 0.1, %v2336_v56  ;;  %v2256_v63 = vadd.f32 %v2255_v13, %v2139_v52 }
 0x1ac   : > { %4253 = vmatprep.subr.mxu1 %v7137_v35  ;;  %v7321_v4 = vpop.f32.mrf.mxu0  ;;  %v2349_v14 = vpop.f32.mrf.mxu1  ;;  %4208 = vmatprep.mubr.f32.mxu0 %v5941_v0  ;;  %v3093_v54 = vmax.f32 %v2341_v8, %v3061_v28  ;;  %v7367_v40 = vand.u32 4294901760, %v3085_v19 }
 0x1ad   : > { %4255 = vmatpush1.msra.mxu1 %v7146_v12  ;;  %v2350_v43 = vadd.f32 %v2349_v14, %v2249_v61  ;;  %4288 = vmatprep.mubr.f32.mxu1 %v5941_v0  ;;  %v3069_v59 = vmul.f32 0.1, %v2348_v10  ;;  %v3094_v60 = vmax.f32 %v2343_v34, %v3062_v29  ;;  %v3086_v47 = vmax.f32 %v2336_v56, %v3054_v22 }
 0x1ae   : > { %v7327_v24 = vpop.f32.mrf.mxu0  ;;  %v2354_v35 = vpop.f32.mrf.mxu1  ;;  %4290 = vmatmul.mubr.f32.vlgmr.msra.gmra.mxu1 %v6864_v6  ;;  %v7351_v42 = vand.u32 4294901760, %v3093_v54  ;;  %v7400_v14 = vsub.f32 %v3085_v19, %v7367_v40 }
 0x1af   : > { %v3070_v50 = vmul.f32 0.1, %v2350_v43  ;;  %v2355_v21 = vadd.f32 %v2354_v35, %v2254_v51  ;;  %4210 = vmatmul.mubr.f32.gmra.mxu0 %v6878_v58  ;;  %4295 = vmatprep.mubr.f32.mxu1 %v5941_v0  ;;  %v3101_v12 = vmax.f32 %v2348_v10, %v3069_v59  ;;  %v7345_v17 = vand.u32 4294901760, %v3094_v60 }
 0x1b0   : > { %v7332_v62 = vpop.f32.mrf.mxu0  ;;  %v2356_v38 = vpop.f32.mrf.mxu1  ;;  %4375 = vmatprep.mubr.f32.mxu0 %v5941_v0  ;;  %v7358_v11 = vand.u32 4294901760, %v3086_v47  ;;  %v7382_v34 = vsub.f32 %v3093_v54, %v7351_v42 }
 0x1b1   : > { %v3102_v23 = vmax.f32 %v2350_v43, %v3070_v50  ;;  %v3077_v32 = vmul.f32 0.1, %v2355_v21  ;;  %v2357_v20 = vadd.f32 %v2356_v38, %v2256_v63  ;;  %v7335_v48 = vand.u32 4294901760, %v3101_v12 }
 0x1b2   : > { %v7337_v7 = vpop.f32.mrf.mxu0  ;;  %v7339_v31 = vpop.f32.mrf.mxu1  ;;  %4297 = vmatmul.mubr.f32.gmra.mxu1 %v6878_v58  ;;  %v7375_v8 = vsub.f32 %v3094_v60, %v7345_v17  ;;  %v7391_v1 = vsub.f32 %v3086_v47, %v7358_v11  ;;  %v4454_v59 = vand.u32 4294901760, %v7382_v34 }
 0x1b3   : > { %v7342_v16 = vand.u32 4294901760, %v3102_v23  ;;  %v3109_v33 = vmax.f32 %v2355_v21, %v3077_v32  ;;  %v3078_v46 = vmul.f32 0.1, %v2357_v20  ;;  %4502 = vmatprep.mubr.f32.mxu1 %v5941_v0  ;;  %v7361_v57 = vsub.f32 %v3101_v12, %v7335_v48 }
 0x1b4   : > { %v7347_v15 = vpop.f32.mrf.mxu0  ;;  %v7349_v2 = vpop.f32.mrf.mxu1  ;;  %v4448_v22 = vand.u32 4294901760, %v7375_v8  ;;  %v7744_v60 = vand.u32 4294901760, %v7391_v1  ;;  %v7743_v12 = vand.u32 4294901760, %v7400_v14  ;;  %v4455_v19 = vsub.f32 %v7382_v34, %v4454_v59 }
 0x1b5   : > { %v7354_v30 = vsub.f32 %v3102_v23, %v7342_v16  ;;  %v7356_v9 = vand.u32 4294901760, %v3109_v33  ;;  %v3110_v44 = vmax.f32 %v2357_v20, %v3078_v46  ;;  %v4442_v61 = vand.u32 4294901760, %v7361_v57 }
 0x1b6   : > { %v7363_v39 = vpop.f32.mrf.mxu0  ;;  %v7365_v3 = vpop.f32.mrf.mxu1  ;;  %v4449_v20 = vsub.f32 %v7375_v8, %v4448_v22 }
 0x1b7   : > { %v7370_v18 = vsub.f32 %v3109_v33, %v7356_v9  ;;  %v7372_v26 = vand.u32 4294901760, %v3110_v44  ;;  %v4436_v25 = vand.u32 4294901760, %v7354_v30  ;;  %v4443_v21 = vsub.f32 %v7361_v57, %v4442_v61 }
 0x1b8   : > { %v7377_v27 = vpop.f32.mrf.mxu0  ;;  %v7379_v56 = vpop.f32.mrf.mxu1 }
 0x1b9   : > { %v4430_v13 = vand.u32 4294901760, %v7370_v18  ;;  %v7386_v41 = vsub.f32 %v3110_v44, %v7372_v26  ;;  %4328 = vmatprep.subr.mxu0 %v7372_v26  ;;  %v4437_v45 = vsub.f32 %v7354_v30, %v4436_v25  ;;  %v4444_v44 = vand.u32 4294901760, %v4443_v21 }
 0x1ba   : > { %v7394_v29 = vpop.f32.mrf.mxu0  ;;  %v7396_v10 = vpop.f32.mrf.mxu1  ;;  %4330 = vmatpush1.msra.mxu0 %v7356_v9  ;;  %v4456_v21 = vand.u32 4294901760, %v4455_v19 }
 0x1bb   : > { %4332 = vmatprep.subr.mxu0 %v7342_v16  ;;  %v4424_v52 = vand.u32 4294901760, %v7386_v41  ;;  %v4431_v43 = vsub.f32 %v7370_v18, %v4430_v13  ;;  %v4438_v47 = vand.u32 4294901760, %v4437_v45 }
 0x1bc   : > { %v7404_v28 = vpop.f32.mrf.mxu0  ;;  %v7406_v51 = vpop.f32.mrf.mxu1  ;;  %4334 = vmatpush1.msra.mxu0 %v7335_v48 }
 0x1bd   : > { %4336 = vmatprep.subr.mxu0 %v7345_v17  ;;  %v4425_v35 = vsub.f32 %v7386_v41, %v4424_v52  ;;  %v4432_v32 = vand.u32 4294901760, %v4431_v43  ;;  %v4461_v43 = vsub.f32 %v7391_v1, %v7744_v60 }
 0x1be   : > { %v7419_v63 = vpop.f32.mrf.mxu0  ;;  %v7421_v50 = vpop.f32.mrf.mxu1  ;;  %4338 = vmatpush1.msra.mxu0 %v7351_v42 }
 0x1bf   : > { %4340 = vmatprep.subr.mxu0 %v7358_v11  ;;  %v4426_v38 = vand.u32 4294901760, %v4425_v35 }
 0x1c0   : > { %v7430_v54 = vpop.f32.mrf.mxu0  ;;  %v7432_v23 = vpop.f32.mrf.mxu1  ;;  %4342 = vmatpush1.msra.mxu0 %v7367_v40 }
 0x1c1   : > { %4427 = vmatprep.subr.mxu1 %v4426_v38  ;;  %4543 = vmatprep.subr.mxu0 %v7386_v41  ;;  %v4467_v41 = vsub.f32 %v7400_v14, %v7743_v12  ;;  %v4450_v38 = vand.u32 4294901760, %v4449_v20  ;;  %v4462_v12 = vand.u32 4294901760, %v4461_v43 }
 0x1c2   : > { %v7442_v33 = vpop.f32.mrf.mxu0  ;;  %v7444_v46 = vpop.f32.mrf.mxu1  ;;  %4381 = vmatmul.mubr.f32.vlgmr.msra.gmra.mxu0 %v6974_v53  ;;  %4433 = vmatpush1.msra.mxu1 %v4432_v32 }
 0x1c3   : > { %4546 = vmatpush1.msra.mxu0 %v7370_v18  ;;  %4439 = vmatprep.subr.mxu1 %v4438_v47  ;;  %v4468_v60 = vand.u32 4294901760, %v4467_v41 }
 0x1c4   : > { %v7454_v35 = vpop.f32.mrf.mxu0  ;;  %4549 = vmatprep.subr.mxu0 %v7354_v30  ;;  %v7457_v45 = vpop.f32.mrf.mxu1  ;;  %4445 = vmatpush1.msra.mxu1 %v4444_v44  ;;  %v2586_v30 = vadd.f32 %v7349_v2, %v7327_v24  ;;  %v2600_v2 = vadd.f32 %v7406_v51, %v7363_v39  ;;  %v7761_v39 = vand.u32 4294901760, %v7400_v14 }
 0x1c5   : > { %4552 = vmatpush1.msra.mxu0 %v7361_v57  ;;  %4386 = vmatprep.mubr.f32.mxu0 %v5941_v0 }
 0x1c6   : > { %v7461_v32 = vpop.f32.mrf.mxu0  ;;  %4451 = vmatprep.subr.mxu1 %v4450_v38  ;;  %4555 = vmatprep.subr.mxu0 %v7375_v8  ;;  %v2808_v47 = vpop.f32.mrf.mxu1 }
 0x1c7   : > { %4392 = vmatmul.mubr.f32.gmra.mxu0 %v7005_v49  ;;  %4457 = vmatpush1.msra.mxu1 %v4456_v21 }
 0x1c8   : > { %4558 = vmatpush1.msra.mxu0 %v7382_v34  ;;  %v7466_v44 = vpop.f32.mrf.mxu0  ;;  %4463 = vmatprep.subr.mxu1 %v4462_v12  ;;  %v2810_v20 = vpop.f32.mrf.mxu1 }
 0x1c9   : > { %4561 = vmatprep.subr.mxu0 %v7391_v1  ;;  %4469 = vmatpush1.msra.mxu1 %v4468_v60 }
 0x1ca   : > { %4564 = vmatpush1.msra.mxu0 %v7400_v14  ;;  %v2719_v19 = vpop.f32.mrf.mxu0  ;;  %4597 = vmatprep.mubr.f32.mxu0 %v5941_v0  ;;  %v2817_v38 = vpop.f32.mrf.mxu1 }
 0x1cb   : > { %4639 = vmatprep.subr.mxu1 %v7372_v26  ;;  %4732 = vmatprep.subr.mxu0 %v4424_v52  ;;  %v2584_v52 = vadd.f32 %v7339_v31, %v7321_v4  ;;  %v2593_v4 = vadd.f32 %v7379_v56, %v7337_v7  ;;  %v2598_v31 = vadd.f32 %v7396_v10, %v7347_v15  ;;  %v7760_v7 = vand.u32 4294901760, %v7391_v1 }
 0x1cc   : > { %4504 = vmatmul.mubr.f32.vlgmr.msra.gmra.mxu1 %v6864_v6  ;;  %4600 = vmatmul.mubr.f32.vlgmr.msra.gmra.mxu0 %v6876_v36  ;;  %v2922_v43 = vpop.f32.mrf.mxu0  ;;  %v2819_v41 = vpop.f32.mrf.mxu1  ;;  %v2605_v15 = vadd.f32 %v7421_v50, %v7377_v27  ;;  %v2607_v56 = vadd.f32 %v7432_v23, %v7394_v29  ;;  %v2712_v29 = vadd.f32 %v7461_v32, %v2600_v2 }
 0x1cd   : > { %4641 = vmatpush1.msra.mxu1 %v7356_v9  ;;  %4736 = vmatpush1.msra.mxu0 %v4430_v13  ;;  %v2694_v57 = vadd.f32 %v7404_v28, %v2584_v52  ;;  %v2704_v34 = vadd.f32 %v7442_v33, %v2593_v4  ;;  %v2710_v1 = vadd.f32 %v7454_v35, %v2598_v31 }
 0x1ce   : > { %4643 = vmatprep.subr.mxu1 %v7342_v16  ;;  %4740 = vmatprep.subr.mxu0 %v4436_v25  ;;  %v2924_v60 = vpop.f32.mrf.mxu0  ;;  %v7480_v12 = vpop.f32.mrf.mxu1  ;;  %v2591_v25 = vadd.f32 %v7365_v3, %v7332_v62  ;;  %v2696_v3 = vadd.f32 %v7419_v63, %v2586_v30  ;;  %v2718_v63 = vadd.f32 %v7466_v44, %v2605_v15 }
 0x1cf   : > { %4645 = vmatpush1.msra.mxu1 %v7335_v48  ;;  %4744 = vmatpush1.msra.mxu0 %v4442_v61  ;;  %v2800_v28 = vadd.f32 %v7444_v46, %v2694_v57  ;;  %v2720_v50 = vadd.f32 %v2719_v19, %v2607_v56  ;;  %v2820_v21 = vadd.f32 %v2819_v41, %v2712_v29 }
 0x1d0   : > { %4509 = vmatprep.mubr.f32.mxu1 %v5941_v0  ;;  %4647 = vmatprep.subr.mxu1 %v7345_v17  ;;  %v2929_v18 = vpop.f32.mrf.mxu0  ;;  %v7489_v13 = vpop.f32.mrf.mxu1  ;;  %v2702_v8 = vadd.f32 %v7430_v54, %v2591_v25  ;;  %v2802_v27 = vadd.f32 %v7457_v45, %v2696_v3 }
 0x1d1   : > { %4748 = vmatprep.subr.mxu0 %v4448_v22  ;;  %4511 = vmatmul.mubr.f32.gmra.mxu1 %v6878_v58  ;;  %v2811_v22 = vadd.f32 %v2810_v20, %v2704_v34  ;;  %v2923_v45 = vadd.f32 %v2922_v43, %v2800_v28 }
 0x1d2   : > { %4649 = vmatpush1.msra.mxu1 %v7351_v42  ;;  %4752 = vmatpush1.msra.mxu0 %v4454_v59  ;;  %v2931_v24 = vpop.f32.mrf.mxu0  ;;  %v3023_v62 = vpop.f32.mrf.mxu1  ;;  %v2809_v51 = vadd.f32 %v2808_v47, %v2702_v8  ;;  %v2925_v23 = vadd.f32 %v2924_v60, %v2802_v27 }
 0x1d3   : > { %4651 = vmatprep.subr.mxu1 %v7358_v11  ;;  %4756 = vmatprep.subr.mxu0 %v7760_v7  ;;  %v2932_v33 = vadd.f32 %v2931_v24, %v2811_v22  ;;  %v3024_v19 = vadd.f32 %v3023_v62, %v2923_v45 }
 0x1d4   : > { %4653 = vmatpush1.msra.mxu1 %v7367_v40  ;;  %4760 = vmatpush1.msra.mxu0 %v7761_v39  ;;  %v2936_v61 = vpop.f32.mrf.mxu0  ;;  %v3025_v10 = vpop.f32.mrf.mxu1  ;;  %v2930_v54 = vadd.f32 %v2929_v18, %v2809_v51 }
 0x1d5   : > { %4686 = vmatprep.mubr.f32.mxu1 %v5941_v0  ;;  %4833 = vmatprep.subr.mxu1 %v7372_v26  ;;  %v2818_v26 = vadd.f32 %v2817_v38, %v2710_v1 }
 0x1d6   : > { %4690 = vmatmul.mubr.f32.vlgmr.msra.gmra.mxu1 %v6905_v37  ;;  %v2938_v14 = vpop.f32.mrf.mxu0  ;;  %v3030_v59 = vpop.f32.mrf.mxu1  ;;  %4605 = vmatprep.mubr.f32.mxu0 %v5941_v0 }
 0x1d7   : > { %4835 = vmatpush1.msra.mxu1 %v7356_v9  ;;  %4608 = vmatmul.mubr.f32.gmra.mxu0 %v6915_v55  ;;  %v3031_v32 = vadd.f32 %v3030_v59, %v2930_v54  ;;  %v2937_v47 = vadd.f32 %v2936_v61, %v2818_v26  ;;  %v3026_v9 = vadd.f32 %v3025_v10, %v2925_v23 }
 0x1d8   : > { %4837 = vmatprep.subr.mxu1 %v7342_v16  ;;  %v2943_v46 = vpop.f32.mrf.mxu0  ;;  %v3032_v35 = vpop.f32.mrf.mxu1  ;;  %4695 = vmatprep.mubr.f32.mxu1 %v5941_v0  ;;  %v2827_v16 = vadd.f32 %v7480_v12, %v2718_v63  ;;  %v2939_v38 = vadd.f32 %v2938_v14, %v2820_v21 }
 0x1d9   : > { %4839 = vmatpush1.msra.mxu1 %v7335_v48  ;;  %4793 = vmatprep.mubr.f32.mxu0 %v5941_v0  ;;  %v3033_v44 = vadd.f32 %v3032_v35, %v2932_v33  ;;  %v3063_v52 = vmul.f32 0.1, %v3031_v32 }
 0x1da   : > { %4841 = vmatprep.subr.mxu1 %v7345_v17  ;;  %v3037_v20 = vpop.f32.mrf.mxu1  ;;  %4699 = vmatmul.mubr.f32.gmra.mxu1 %v6950_v5  ;;  %v2945_v43 = vpop.f32.mrf.mxu0  ;;  %v2829_v17 = vadd.f32 %v7489_v13, %v2720_v50  ;;  %v2944_v18 = vadd.f32 %v2943_v46, %v2827_v16 }
 0x1db   : > { %4843 = vmatpush1.msra.mxu1 %v7351_v42  ;;  %4795 = vmatmul.mubr.f32.vlgmr.msra.gmra.mxu0 %v6864_v6  ;;  %v3064_v48 = vmul.f32 0.1, %v3033_v44  ;;  %v3038_v41 = vadd.f32 %v3037_v20, %v2937_v47  ;;  %v3056_v42 = vmul.f32 0.1, %v3026_v9 }
 0x1dc   : > { %4845 = vmatprep.subr.mxu1 %v7358_v11  ;;  %v3039_v60 = vpop.f32.mrf.mxu1  ;;  %4880 = vmatprep.mubr.f32.mxu1 %v5941_v0  ;;  %v3055_v11 = vmul.f32 0.1, %v3024_v19  ;;  %v2946_v4 = vadd.f32 %v2945_v43, %v2829_v17 }
 0x1dd   : > { %4847 = vmatpush1.msra.mxu1 %v7367_v40  ;;  %v3040_v12 = vadd.f32 %v3039_v60, %v2939_v38  ;;  %4800 = vmatprep.mubr.f32.mxu0 %v5941_v0  ;;  %v3071_v30 = vmul.f32 0.1, %v3038_v41  ;;  %v3096_v13 = vmax.f32 %v3033_v44, %v3064_v48  ;;  %v3095_v40 = vmax.f32 %v3031_v32, %v3063_v52 }
 0x1de   : > { %v3044_v25 = vpop.f32.mrf.mxu1  ;;  %4882 = vmatmul.mubr.f32.vlgmr.msra.gmra.mxu1 %v6864_v6  ;;  %v3088_v7 = vmax.f32 %v3026_v9, %v3056_v42  ;;  %v3087_v56 = vmax.f32 %v3024_v19, %v3055_v11 }
 0x1df   : > { %v3072_v31 = vmul.f32 0.1, %v3040_v12  ;;  %v3045_v57 = vadd.f32 %v3044_v25, %v2944_v18  ;;  %4802 = vmatmul.mubr.f32.gmra.mxu0 %v6878_v58  ;;  %4887 = vmatprep.mubr.f32.mxu1 %v5941_v0  ;;  %v3103_v24 = vmax.f32 %v3038_v41, %v3071_v30  ;;  %v7556_v10 = vand.u32 4294901760, %v3096_v13 }
 0x1e0   : > { %v3046_v62 = vpop.f32.mrf.mxu1  ;;  %4967 = vmatprep.mubr.f32.mxu0 %v5941_v0  ;;  %v7558_v28 = vand.u32 4294901760, %v3095_v40  ;;  %v7565_v29 = vand.u32 4294901760, %v3088_v7  ;;  %v7570_v14 = vand.u32 4294901760, %v3087_v56 }
 0x1e1   : > { %v3104_v2 = vmax.f32 %v3040_v12, %v3072_v31  ;;  %v3079_v3 = vmul.f32 0.1, %v3045_v57  ;;  %v3047_v8 = vadd.f32 %v3046_v62, %v2946_v4  ;;  %v7550_v15 = vand.u32 4294901760, %v3103_v24 }
 0x1e2   : > { %4889 = vmatmul.mubr.f32.gmra.mxu1 %v6878_v58  ;;  %v7578_v50 = vsub.f32 %v3096_v13, %v7556_v10  ;;  %v7581_v54 = vsub.f32 %v3095_v40, %v7558_v28  ;;  %v7588_v46 = vsub.f32 %v3088_v7, %v7565_v29  ;;  %v7593_v45 = vsub.f32 %v3087_v56, %v7570_v14 }
 0x1e3   : > { %v7553_v34 = vand.u32 4294901760, %v3104_v2  ;;  %v3111_v39 = vmax.f32 %v3045_v57, %v3079_v3  ;;  %v3080_v61 = vmul.f32 0.1, %v3047_v8  ;;  %5094 = vmatprep.mubr.f32.mxu1 %v5941_v0  ;;  %v7568_v22 = vsub.f32 %v3103_v24, %v7550_v15 }
 0x1e4   : > { %v5040_v47 = vand.u32 4294901760, %v7578_v50  ;;  %v5046_v9 = vand.u32 4294901760, %v7581_v54  ;;  %v5052_v19 = vand.u32 4294901760, %v7588_v46  ;;  %v5058_v38 = vand.u32 4294901760, %v7593_v45 }
 0x1e5   : > { %v7561_v1 = vsub.f32 %v3104_v2, %v7553_v34  ;;  %v7563_v51 = vand.u32 4294901760, %v3111_v39  ;;  %v3112_v27 = vmax.f32 %v3047_v8, %v3080_v61  ;;  %v5034_v35 = vand.u32 4294901760, %v7568_v22 }
 0x1e6   : > { %v5041_v41 = vsub.f32 %v7578_v50, %v5040_v47  ;;  %v5047_v17 = vsub.f32 %v7581_v54, %v5046_v9  ;;  %v5053_v18 = vsub.f32 %v7588_v46, %v5052_v19  ;;  %v5059_v12 = vsub.f32 %v7593_v45, %v5058_v38 }
 0x1e7   : > { %v7573_v59 = vsub.f32 %v3111_v39, %v7563_v51  ;;  %v7575_v63 = vand.u32 4294901760, %v3112_v27  ;;  %v5028_v33 = vand.u32 4294901760, %v7561_v1  ;;  %v5035_v16 = vsub.f32 %v7568_v22, %v5034_v35 }
 0x1e8   : > { %v5042_v42 = vand.u32 4294901760, %v5041_v41  ;;  %v5048_v30 = vand.u32 4294901760, %v5047_v17  ;;  %v5060_v25 = vand.u32 4294901760, %v5059_v12 }
 0x1e9   : > { %v5022_v26 = vand.u32 4294901760, %v7573_v59  ;;  %v5015_v23 = vsub.f32 %v3112_v27, %v7575_v63  ;;  %4920 = vmatprep.subr.mxu0 %v7575_v63  ;;  %v5029_v20 = vsub.f32 %v7561_v1, %v5028_v33  ;;  %v5036_v52 = vand.u32 4294901760, %v5035_v16 }
 0x1ea   : > { %4922 = vmatpush1.msra.mxu0 %v7563_v51 }
 0x1eb   : > { %4924 = vmatprep.subr.mxu0 %v7553_v34  ;;  %v5016_v21 = vand.u32 4294901760, %v5015_v23  ;;  %v5023_v32 = vsub.f32 %v7573_v59, %v5022_v26  ;;  %v5030_v60 = vand.u32 4294901760, %v5029_v20 }
 0x1ec   : > { %4926 = vmatpush1.msra.mxu0 %v7550_v15 }
 0x1ed   : > { %4928 = vmatprep.subr.mxu0 %v7556_v10  ;;  %v5017_v44 = vsub.f32 %v5015_v23, %v5016_v21  ;;  %v5024_v43 = vand.u32 4294901760, %v5023_v32 }
 0x1ee   : > { %4930 = vmatpush1.msra.mxu0 %v7558_v28 }
 0x1ef   : > { %4932 = vmatprep.subr.mxu0 %v7565_v29  ;;  %v5018_v48 = vand.u32 4294901760, %v5017_v44 }
 0x1f0   : > { %4934 = vmatpush1.msra.mxu0 %v7570_v14 }
 0x1f1   : > { %5019 = vmatprep.subr.mxu1 %v5018_v48  ;;  %5135 = vmatprep.subr.mxu0 %v5015_v23 }
 0x1f2   : > { %4973 = vmatmul.mubr.f32.vlgmr.msra.gmra.mxu0 %v6974_v53  ;;  %5025 = vmatpush1.msra.mxu1 %v5024_v43  ;;  %v5054_v53 = vand.u32 4294901760, %v5053_v18 }
 0x1f3   : > { %5138 = vmatpush1.msra.mxu0 %v7573_v59  ;;  %5031 = vmatprep.subr.mxu1 %v5030_v60 }
 0x1f4   : > { %5141 = vmatprep.subr.mxu0 %v7561_v1  ;;  %5037 = vmatpush1.msra.mxu1 %v5036_v52 }
 0x1f5   : > { %5144 = vmatpush1.msra.mxu0 %v7568_v22  ;;  %4978 = vmatprep.mubr.f32.mxu0 %v5941_v0 }
 0x1f6   : > { %5043 = vmatprep.subr.mxu1 %v5042_v42  ;;  %5147 = vmatprep.subr.mxu0 %v7578_v50 }
 0x1f7   : > { %4984 = vmatmul.mubr.f32.gmra.mxu0 %v7005_v49  ;;  %5049 = vmatpush1.msra.mxu1 %v5048_v30 }
 0x1f8   : > { %5150 = vmatpush1.msra.mxu0 %v7581_v54  ;;  %5055 = vmatprep.subr.mxu1 %v5054_v53 }
 0x1f9   : > { %5153 = vmatprep.subr.mxu0 %v7588_v46  ;;  %5061 = vmatpush1.msra.mxu1 %v5060_v25 }
 0x1fa   : > { %5156 = vmatpush1.msra.mxu0 %v7593_v45  ;;  %5096 = vmatmul.mubr.f32.vlgmr.msra.gmra.mxu1 %v6864_v6 }
 0x1fb   : > { %5189 = vmatprep.mubr.f32.mxu0 %v5941_v0  ;;  %5231 = vmatprep.subr.mxu1 %v7575_v63 }
 0x1fc   : > { %5324 = vmatprep.subr.mxu0 %v5016_v21  ;;  %5192 = vmatmul.mubr.f32.vlgmr.msra.gmra.mxu0 %v6876_v36 }
 0x1fd   : > { %5233 = vmatpush1.msra.mxu1 %v7563_v51  ;;  %5328 = vmatpush1.msra.mxu0 %v5022_v26 }
 0x1fe   : > { %5235 = vmatprep.subr.mxu1 %v7553_v34  ;;  %5332 = vmatprep.subr.mxu0 %v5028_v33 }
 0x1ff   : > { %5101 = vmatprep.mubr.f32.mxu1 %v5941_v0  ;;  %5237 = vmatpush1.msra.mxu1 %v7550_v15 }
 0x200   : > { %5336 = vmatpush1.msra.mxu0 %v5034_v35  ;;  %5103 = vmatmul.mubr.f32.gmra.mxu1 %v6878_v58 }
 0x201   : > { %5239 = vmatprep.subr.mxu1 %v7556_v10  ;;  %5340 = vmatprep.subr.mxu0 %v5040_v47 }
 0x202   : > { %5197 = vmatprep.mubr.f32.mxu0 %v5941_v0  ;;  %5241 = vmatpush1.msra.mxu1 %v7558_v28 }
 0x203   : > { %5344 = vmatpush1.msra.mxu0 %v5046_v9  ;;  %5243 = vmatprep.subr.mxu1 %v7565_v29 }
 0x204   : > { %5200 = vmatmul.mubr.f32.gmra.mxu0 %v6915_v55  ;;  %5348 = vmatprep.subr.mxu0 %v5052_v19 }
 0x205   : > { %5245 = vmatpush1.msra.mxu1 %v7570_v14  ;;  %5278 = vmatprep.mubr.f32.mxu1 %v5941_v0 }
 0x206   : > { %5352 = vmatpush1.msra.mxu0 %v5058_v38  ;;  %5282 = vmatmul.mubr.f32.vlgmr.msra.gmra.mxu1 %v6905_v37 }
 0x207   : > { %5425 = vmatprep.subr.mxu1 %v7575_v63  ;;  %5385 = vmatprep.mubr.f32.mxu0 %v5941_v0 }
 0x208   : > { %5427 = vmatpush1.msra.mxu1 %v7563_v51  ;;  %5387 = vmatmul.mubr.f32.vlgmr.msra.gmra.mxu0 %v6864_v6 }
 0x209   : > { %5429 = vmatprep.subr.mxu1 %v7553_v34  ;;  %5287 = vmatprep.mubr.f32.mxu1 %v5941_v0 }
 0x20a   : > { %5431 = vmatpush1.msra.mxu1 %v7550_v15  ;;  %5392 = vmatprep.mubr.f32.mxu0 %v5941_v0 }
 0x20b   : > { %5291 = vmatmul.mubr.f32.gmra.mxu1 %v6950_v5  ;;  %5433 = vmatprep.subr.mxu1 %v7556_v10 }
 0x20c   : > { %5435 = vmatpush1.msra.mxu1 %v7558_v28  ;;  %5394 = vmatmul.mubr.f32.gmra.mxu0 %v6878_v58 }
 0x20d   : > { %5437 = vmatprep.subr.mxu1 %v7565_v29  ;;  %5472 = vmatprep.mubr.f32.mxu1 %v5941_v0 }
 0x20e   : > { %5439 = vmatpush1.msra.mxu1 %v7570_v14 }
 0x20f   : > { %5474 = vmatmul.mubr.f32.vlgmr.msra.gmra.mxu1 %v6864_v6 }
 0x210   : > { %5479 = vmatprep.mubr.f32.mxu1 %v5941_v0 }
 0x213   : > { %5481 = vmatmul.mubr.f32.gmra.mxu1 %v6878_v58 }
 0x222   : > { %v3198_v36 = vpop.f32.mrf.mxu0 }
 0x224   : > { %v3200_v37 = vpop.f32.mrf.mxu0 }
 0x227   : > { %v3209_v55 = vpop.f32.mrf.mxu0 }
 0x229   : > { %v3211_v5 = vpop.f32.mrf.mxu0 }
 0x22c   : > { %v3321_v49 = vpop.f32.mrf.mxu1  ;;  %v3417_v4 = vpop.f32.mrf.mxu0 }
 0x22d   : > { %v3322_v31 = vadd.f32 %v3321_v49, %v3198_v36 }
 0x22e   : > { %v3323_v11 = vpop.f32.mrf.mxu1  ;;  %v3419_v62 = vpop.f32.mrf.mxu0 }
 0x22f   : > { %v3324_v13 = vadd.f32 %v3323_v11, %v3200_v37  ;;  %v3418_v2 = vadd.f32 %v3417_v4, %v3322_v31 }
 0x231   : > { %v3328_v57 = vpop.f32.mrf.mxu1  ;;  %v3420_v6 = vadd.f32 %v3419_v62, %v3324_v13 }
 0x232   : > { %v3329_v40 = vadd.f32 %v3328_v57, %v3209_v55 }
 0x233   : > { %v3330_v24 = vpop.f32.mrf.mxu1 }
 0x234   : > { %v3331_v3 = vadd.f32 %v3330_v24, %v3211_v5 }
 0x236   : > { %v3507_v8 = vpop.f32.mrf.mxu1 }
 0x237   : > { %v3425_v0 = vpop.f32.mrf.mxu0  ;;  %v3508_v58 = vadd.f32 %v3507_v8, %v3418_v2 }
 0x238   : > { %v3426_v7 = vadd.f32 %v3425_v0, %v3329_v40  ;;  %v3509_v15 = vpop.f32.mrf.mxu1 }
 0x239   : > { %v3427_v56 = vpop.f32.mrf.mxu0  ;;  %v3510_v34 = vadd.f32 %v3509_v15, %v3420_v6 }
 0x23a   : > { %v3428_v39 = vadd.f32 %v3427_v56, %v3331_v3  ;;  %v3516_v61 = vpop.f32.mrf.mxu1 }
 0x23b   : > { %v3612_v10 = vpop.f32.mrf.mxu0  ;;  %v3517_v28 = vadd.f32 %v3516_v61, %v3426_v7 }
 0x23c   : > { %v3518_v1 = vpop.f32.mrf.mxu1  ;;  %v3613_v51 = vadd.f32 %v3612_v10, %v3508_v58 }
 0x23d   : > { %v3614_v27 = vpop.f32.mrf.mxu0  ;;  %v3519_v29 = vadd.f32 %v3518_v1, %v3428_v39 }
 0x23e   : > { %v3615_v22 = vadd.f32 %v3614_v27, %v3510_v34  ;;  %v3699_v14 = vpop.f32.mrf.mxu1 }
 0x23f   : > { %v3700_v59 = vadd.f32 %v3699_v14, %v3613_v51  ;;  %v3619_v63 = vpop.f32.mrf.mxu0 }
 0x240   : > { %v3620_v50 = vadd.f32 %v3619_v63, %v3517_v28  ;;  %v3701_v54 = vpop.f32.mrf.mxu1 }
 0x241   : > { %v5487_v26 = vmul.f32 0.1, %v3700_v59  ;;  %v3702_v23 = vadd.f32 %v3701_v54, %v3615_v22  ;;  %v3621_v33 = vpop.f32.mrf.mxu0 }
 0x242   : > { %v3622_v46 = vadd.f32 %v3621_v33, %v3519_v29  ;;  %v3706_v35 = vpop.f32.mrf.mxu1 }
 0x243   : > { %v5503_v45 = vmax.f32 %v3700_v59, %v5487_v26  ;;  %v5488_v21 = vmul.f32 0.1, %v3702_v23  ;;  %v3707_v32 = vadd.f32 %v3706_v35, %v3620_v50 }
 0x244   : > { %v3708_v47 = vpop.f32.mrf.mxu1 }
 0x245   : > { %5519 = vst [vmem:[%s7658_s22] sm:$0xff] %v5503_v45  ;;  %v5504_v9 = vmax.f32 %v3702_v23, %v5488_v21  ;;  %v5495_v44 = vmul.f32 0.1, %v3707_v32  ;;  %v3709_v20 = vadd.f32 %v3708_v47, %v3622_v46 }
 0x247   : > { %5520 = vst [vmem:[%s7658_s22 + $0x8] sm:$0xff] %v5504_v9  ;;  %v5511_v16 = vmax.f32 %v3707_v32, %v5495_v44  ;;  %v5496_v19 = vmul.f32 0.1, %v3709_v20 }
 0x249   : > { %5527 = vst [vmem:[%s7658_s22 + $0x40] sm:$0xff] %v5511_v16  ;;  %v5512_v38 = vmax.f32 %v3709_v20, %v5496_v19 }
 0x24b   : > { %5528 = vst [vmem:[%s7658_s22 + $0x48] sm:$0xff] %v5512_v38 }
 0x252   : > { %v3790_v48 = vpop.f32.mrf.mxu0 }
 0x254   : > { %v3792_v43 = vpop.f32.mrf.mxu0 }
 0x257   : > { %v3801_v41 = vpop.f32.mrf.mxu0 }
 0x259   : > { %v3803_v60 = vpop.f32.mrf.mxu0 }
 0x25c   : > { %v3913_v17 = vpop.f32.mrf.mxu1  ;;  %v4009_v18 = vpop.f32.mrf.mxu0 }
 0x25d   : > { %v3914_v12 = vadd.f32 %v3913_v17, %v3790_v48 }
 0x25e   : > { %v3915_v52 = vpop.f32.mrf.mxu1  ;;  %v4011_v25 = vpop.f32.mrf.mxu0 }
 0x25f   : > { %v3916_v30 = vadd.f32 %v3915_v52, %v3792_v43  ;;  %v4010_v37 = vadd.f32 %v4009_v18, %v3914_v12 }
 0x261   : > { %v3920_v42 = vpop.f32.mrf.mxu1  ;;  %v4012_v5 = vadd.f32 %v4011_v25, %v3916_v30 }
 0x262   : > { %v3921_v36 = vadd.f32 %v3920_v42, %v3801_v41 }
 0x263   : > { %v3922_v53 = vpop.f32.mrf.mxu1 }
 0x264   : > { %v3923_v55 = vadd.f32 %v3922_v53, %v3803_v60 }
 0x266   : > { %v4099_v49 = vpop.f32.mrf.mxu1 }
 0x267   : > { %v4017_v11 = vpop.f32.mrf.mxu0  ;;  %v4100_v4 = vadd.f32 %v4099_v49, %v4010_v37 }
 0x268   : > { %v4018_v31 = vadd.f32 %v4017_v11, %v3921_v36  ;;  %v4101_v57 = vpop.f32.mrf.mxu1 }
 0x269   : > { %v4019_v13 = vpop.f32.mrf.mxu0  ;;  %v4102_v24 = vadd.f32 %v4101_v57, %v4012_v5 }
 0x26a   : > { %v4020_v62 = vadd.f32 %v4019_v13, %v3923_v55  ;;  %v4108_v40 = vpop.f32.mrf.mxu1 }
 0x26b   : > { %v4204_v2 = vpop.f32.mrf.mxu0  ;;  %v4109_v3 = vadd.f32 %v4108_v40, %v4018_v31 }
 0x26c   : > { %v4110_v6 = vpop.f32.mrf.mxu1  ;;  %v4205_v8 = vadd.f32 %v4204_v2, %v4100_v4 }
 0x26d   : > { %v4206_v0 = vpop.f32.mrf.mxu0  ;;  %v4111_v58 = vadd.f32 %v4110_v6, %v4020_v62 }
 0x26e   : > { %v4207_v7 = vadd.f32 %v4206_v0, %v4102_v24  ;;  %v4291_v15 = vpop.f32.mrf.mxu1 }
 0x26f   : > { %v4292_v56 = vadd.f32 %v4291_v15, %v4205_v8  ;;  %v4211_v34 = vpop.f32.mrf.mxu0 }
 0x270   : > { %v4212_v39 = vadd.f32 %v4211_v34, %v4109_v3  ;;  %v4293_v61 = vpop.f32.mrf.mxu1 }
 0x271   : > { %v5489_v10 = vmul.f32 0.1, %v4292_v56  ;;  %v4294_v28 = vadd.f32 %v4293_v61, %v4207_v7  ;;  %v4213_v1 = vpop.f32.mrf.mxu0 }
 0x272   : > { %v4214_v51 = vadd.f32 %v4213_v1, %v4111_v58  ;;  %v4298_v27 = vpop.f32.mrf.mxu1 }
 0x273   : > { %v5505_v29 = vmax.f32 %v4292_v56, %v5489_v10  ;;  %v5490_v22 = vmul.f32 0.1, %v4294_v28  ;;  %v4299_v14 = vadd.f32 %v4298_v27, %v4212_v39 }
 0x274   : > { %v4300_v59 = vpop.f32.mrf.mxu1 }
 0x275   : > { %5521 = vst [vmem:[%s7658_s22 + $0x10] sm:$0xff] %v5505_v29  ;;  %v5506_v63 = vmax.f32 %v4294_v28, %v5490_v22  ;;  %v5497_v50 = vmul.f32 0.1, %v4299_v14  ;;  %v4301_v54 = vadd.f32 %v4300_v59, %v4214_v51 }
 0x277   : > { %5522 = vst [vmem:[%s7658_s22 + $0x18] sm:$0xff] %v5506_v63  ;;  %v5513_v26 = vmax.f32 %v4299_v14, %v5497_v50  ;;  %v5498_v23 = vmul.f32 0.1, %v4301_v54 }
 0x279   : > { %5529 = vst [vmem:[%s7658_s22 + $0x50] sm:$0xff] %v5513_v26  ;;  %v5514_v33 = vmax.f32 %v4301_v54, %v5498_v23 }
 0x27b   : > { %5530 = vst [vmem:[%s7658_s22 + $0x58] sm:$0xff] %v5514_v33 }
 0x282   : > { %v4382_v46 = vpop.f32.mrf.mxu0 }
 0x284   : > { %v4384_v35 = vpop.f32.mrf.mxu0 }
 0x287   : > { %v4393_v45 = vpop.f32.mrf.mxu0 }
 0x289   : > { %v4395_v21 = vpop.f32.mrf.mxu0 }
 0x28c   : > { %v4505_v32 = vpop.f32.mrf.mxu1  ;;  %v4601_v9 = vpop.f32.mrf.mxu0 }
 0x28d   : > { %v4506_v44 = vadd.f32 %v4505_v32, %v4382_v46 }
 0x28e   : > { %v4507_v47 = vpop.f32.mrf.mxu1  ;;  %v4603_v38 = vpop.f32.mrf.mxu0 }
 0x28f   : > { %v4508_v16 = vadd.f32 %v4507_v47, %v4384_v35  ;;  %v4602_v43 = vadd.f32 %v4601_v9, %v4506_v44 }
 0x291   : > { %v4512_v20 = vpop.f32.mrf.mxu1  ;;  %v4604_v60 = vadd.f32 %v4603_v38, %v4508_v16 }
 0x292   : > { %v4513_v48 = vadd.f32 %v4512_v20, %v4393_v45 }
 0x293   : > { %v4514_v19 = vpop.f32.mrf.mxu1 }
 0x294   : > { %v4515_v41 = vadd.f32 %v4514_v19, %v4395_v21 }
 0x296   : > { %v4691_v17 = vpop.f32.mrf.mxu1 }
 0x297   : > { %v4609_v52 = vpop.f32.mrf.mxu0  ;;  %v4692_v18 = vadd.f32 %v4691_v17, %v4602_v43 }
 0x298   : > { %v4610_v12 = vadd.f32 %v4609_v52, %v4513_v48  ;;  %v4693_v42 = vpop.f32.mrf.mxu1 }
 0x299   : > { %v4611_v30 = vpop.f32.mrf.mxu0  ;;  %v4694_v53 = vadd.f32 %v4693_v42, %v4604_v60 }
 0x29a   : > { %v4612_v25 = vadd.f32 %v4611_v30, %v4515_v41  ;;  %v4700_v36 = vpop.f32.mrf.mxu1 }
 0x29b   : > { %v4796_v37 = vpop.f32.mrf.mxu0  ;;  %v4701_v55 = vadd.f32 %v4700_v36, %v4610_v12 }
 0x29c   : > { %v4702_v5 = vpop.f32.mrf.mxu1  ;;  %v4797_v49 = vadd.f32 %v4796_v37, %v4692_v18 }
 0x29d   : > { %v4798_v11 = vpop.f32.mrf.mxu0  ;;  %v4703_v4 = vadd.f32 %v4702_v5, %v4612_v25 }
 0x29e   : > { %v4799_v31 = vadd.f32 %v4798_v11, %v4694_v53  ;;  %v4883_v57 = vpop.f32.mrf.mxu1 }
 0x29f   : > { %v4884_v13 = vadd.f32 %v4883_v57, %v4797_v49  ;;  %v4803_v24 = vpop.f32.mrf.mxu0 }
 0x2a0   : > { %v4804_v62 = vadd.f32 %v4803_v24, %v4701_v55  ;;  %v4885_v40 = vpop.f32.mrf.mxu1 }
 0x2a1   : > { %v5491_v2 = vmul.f32 0.1, %v4884_v13  ;;  %v4886_v3 = vadd.f32 %v4885_v40, %v4799_v31  ;;  %v4805_v6 = vpop.f32.mrf.mxu0 }
 0x2a2   : > { %v4806_v8 = vadd.f32 %v4805_v6, %v4703_v4  ;;  %v4890_v0 = vpop.f32.mrf.mxu1 }
 0x2a3   : > { %v5507_v58 = vmax.f32 %v4884_v13, %v5491_v2  ;;  %v5492_v7 = vmul.f32 0.1, %v4886_v3  ;;  %v4891_v15 = vadd.f32 %v4890_v0, %v4804_v62 }
 0x2a4   : > { %v4892_v56 = vpop.f32.mrf.mxu1 }
 0x2a5   : > { %5523 = vst [vmem:[%s7658_s22 + $0x20] sm:$0xff] %v5507_v58  ;;  %v5508_v34 = vmax.f32 %v4886_v3, %v5492_v7  ;;  %v5499_v39 = vmul.f32 0.1, %v4891_v15  ;;  %v4893_v61 = vadd.f32 %v4892_v56, %v4806_v8 }
 0x2a7   : > { %5524 = vst [vmem:[%s7658_s22 + $0x28] sm:$0xff] %v5508_v34  ;;  %v5515_v10 = vmax.f32 %v4891_v15, %v5499_v39  ;;  %v5500_v28 = vmul.f32 0.1, %v4893_v61 }
 0x2a9   : > { %5531 = vst [vmem:[%s7658_s22 + $0x60] sm:$0xff] %v5515_v10  ;;  %v5516_v1 = vmax.f32 %v4893_v61, %v5500_v28 }
 0x2ab   : > { %5532 = vst [vmem:[%s7658_s22 + $0x68] sm:$0xff] %v5516_v1 }
 0x2b2   : > { %v4974_v51 = vpop.f32.mrf.mxu0 }
 0x2b4   : > { %v4976_v27 = vpop.f32.mrf.mxu0 }
 0x2b7   : > { %v4985_v29 = vpop.f32.mrf.mxu0 }
 0x2b9   : > { %v4987_v22 = vpop.f32.mrf.mxu0 }
 0x2ba   : > { %v5097_v14 = vpop.f32.mrf.mxu1 }
 0x2bb   : > { %v5098_v23 = vadd.f32 %v5097_v14, %v4974_v51 }
 0x2bc   : > { %v5099_v59 = vpop.f32.mrf.mxu1  ;;  %v5193_v63 = vpop.f32.mrf.mxu0 }
 0x2bd   : > { %v5100_v46 = vadd.f32 %v5099_v59, %v4976_v27  ;;  %v5194_v21 = vadd.f32 %v5193_v63, %v5098_v23 }
 0x2be   : > { %v5195_v54 = vpop.f32.mrf.mxu0 }
 0x2bf   : > { %v5196_v44 = vadd.f32 %v5195_v54, %v5100_v46 }
 0x2c0   : > { %v5104_v50 = vpop.f32.mrf.mxu1 }
 0x2c1   : > { %v5105_v32 = vadd.f32 %v5104_v50, %v4985_v29 }
 0x2c2   : > { %v5106_v26 = vpop.f32.mrf.mxu1 }
 0x2c3   : > { %v5107_v20 = vadd.f32 %v5106_v26, %v4987_v22 }
 0x2c4   : > { %v5201_v33 = vpop.f32.mrf.mxu0 }
 0x2c5   : > { %v5202_v48 = vadd.f32 %v5201_v33, %v5105_v32 }
 0x2c6   : > { %v5203_v35 = vpop.f32.mrf.mxu0  ;;  %v5283_v45 = vpop.f32.mrf.mxu1 }
 0x2c7   : > { %v5284_v16 = vadd.f32 %v5283_v45, %v5194_v21  ;;  %v5204_v17 = vadd.f32 %v5203_v35, %v5107_v20 }
 0x2c8   : > { %v5285_v47 = vpop.f32.mrf.mxu1  ;;  %v5388_v9 = vpop.f32.mrf.mxu0 }
 0x2c9   : > { %v5286_v43 = vadd.f32 %v5285_v47, %v5196_v44  ;;  %v5389_v52 = vadd.f32 %v5388_v9, %v5284_v16 }
 0x2ca   : > { %v5390_v19 = vpop.f32.mrf.mxu0 }
 0x2cb   : > { %v5292_v38 = vpop.f32.mrf.mxu1  ;;  %v5391_v42 = vadd.f32 %v5390_v19, %v5286_v43 }
 0x2cc   : > { %v5395_v60 = vpop.f32.mrf.mxu0  ;;  %v5293_v18 = vadd.f32 %v5292_v38, %v5202_v48 }
 0x2cd   : > { %v5294_v41 = vpop.f32.mrf.mxu1 }
 0x2ce   : > { %v5295_v30 = vadd.f32 %v5294_v41, %v5204_v17  ;;  %v5397_v25 = vpop.f32.mrf.mxu0  ;;  %v5396_v37 = vadd.f32 %v5395_v60, %v5293_v18 }
 0x2cf   : > { %v5475_v12 = vpop.f32.mrf.mxu1 }
 0x2d0   : > { %v5476_v53 = vadd.f32 %v5475_v12, %v5389_v52  ;;  %v5398_v11 = vadd.f32 %v5397_v25, %v5295_v30 }
 0x2d1   : > { %v5477_v36 = vpop.f32.mrf.mxu1 }
 0x2d2   : > { %v5493_v55 = vmul.f32 0.1, %v5476_v53  ;;  %v5478_v5 = vadd.f32 %v5477_v36, %v5391_v42 }
 0x2d3   : > { %v5482_v49 = vpop.f32.mrf.mxu1 }
 0x2d4   : > { %v5509_v4 = vmax.f32 %v5476_v53, %v5493_v55  ;;  %v5494_v31 = vmul.f32 0.1, %v5478_v5  ;;  %v5483_v57 = vadd.f32 %v5482_v49, %v5396_v37 }
 0x2d5   : > { %v5484_v13 = vpop.f32.mrf.mxu1 }
 0x2d6   : > { %5525 = vst [vmem:[%s7658_s22 + $0x30] sm:$0xff] %v5509_v4  ;;  %v5510_v24 = vmax.f32 %v5478_v5, %v5494_v31  ;;  %v5501_v62 = vmul.f32 0.1, %v5483_v57  ;;  %v5485_v40 = vadd.f32 %v5484_v13, %v5398_v11 }
 0x2d8   : > { %5526 = vst [vmem:[%s7658_s22 + $0x38] sm:$0xff] %v5510_v24  ;;  %v5517_v2 = vmax.f32 %v5483_v57, %v5501_v62  ;;  %v5502_v3 = vmul.f32 0.1, %v5485_v40 }
 0x2da   : > { %5533 = vst [vmem:[%s7658_s22 + $0x70] sm:$0xff] %v5517_v2  ;;  %v5518_v6 = vmax.f32 %v5485_v40, %v5502_v3 }
 0x2dc   : > { %5534 = vst [vmem:[%s7658_s22 + $0x78] sm:$0xff] %v5518_v6 }
 0x2dd   : > { %5861 = shalt.err (!%p5858_p5)
}
 0x2de   : > { %s5862_s27 = scalar_lea.hbm %s7679_s8, 2048  ;;  %s5866_s4 = scalar_lea.hbm %s7734_s3, 4096 }
 0x2df   : > { %p5863_p10 = scmp.ne.s32.totalorder %s7679_s8, %s5862_s27  ;;  %p5867_p6 = scmp.lt.s32.totalorder %s7679_s8, %s7734_s3 }
 0x2e0   : > { %p5868_p12 = scmp.lt.s32.totalorder %s5866_s4, %s5862_s27 }
 0x2e1   : > { %p5864_p1 = pnand %p5863_p10, %p6060_p7 }
 0x2e2   : > { %p5869_p3 = por %p5868_p12, %p5867_p6 }
 0x2e3   : > { %p5865_p4 = pneg %p5864_p1 }
 0x2e5   : > { %p5870_p8 = pnand %p5869_p3, %p5865_p4 }
 0x2e7   : > { %5873 = shalt.err (!%p5870_p8)
}
 0x2e8   : > { %s5943_s22 = smov 1024   ;;  %s5944_s24 = smov 64  }
 0x2e9   : > { %5688 = dma.vmem_to_hbm [thread:$0]  (%p6060_p7), %s7681_s5, 2048, %s7679_s8, %s5536_s9, %s5943_s22, %s5943_s22, %s5944_s24  }
 0x2ea PF: > { %s5566_s7 = sand.u32 1, %s5912_s12   ;;  %p7762_p9 = scmp.ne.s32.totalorder %s7748_s23, 0 }
 0x2eb   : > { %p7763_p11 = scmp.ge.s32.totalorder %s5932_s17, 2  ;;  %s5567_s21 = scalar_lea.sflag [#allocation4], %s5566_s7 }
 0x2ed   : > { %p5702_p2 = pnand %p7763_p11, %p7762_p9 }
 0x2ef   : > { %p5703_p13 = pneg %p5702_p2 }
 0x2f1   : > { %5907 = dma.done.wait (%p5703_p13), %s5567_s21, 2048  }
 0x2f2   : > { %5909 = vsyncadd (%p5703_p13), %s5567_s21, 4294965248  ;;  %s20_s17 = sadd.s32 1, %s5932_s17   ;;  %s7764_s12 = smov %s5916_s13 }
 0x2f3   : > { %p17_p0 = scmp.ge.s32.totalorder %s20_s17, 4   ;;  %s7765_s13 = smov %s5920_s14 }
 0x2f4   : > { %s7766_s14 = smov %s6069_s29  ;;  %s7767_s15 = smov %s5928_s16 }
 0x2f5   : > { %s7768_s16 = smov %s7770_s11  ;;  %19 = sbr.rel (!%p17_p0) target bundleno = 7 (0x7), region = 85 }
 0x2fa   :  { %5572 = vsyncpa [#allocation3], 1 }
 0x2fb   :  { %5574 = vsyncpa [#allocation3 + $0x1], 1 }
 0x2fc   :  { %5575 = vsyncpa [#allocation6], 1 }
 0x2fd   :  { %5576 = vsyncpa [#allocation4], 1 }
 0x2fe   :  { %5578 = vsyncpa [#allocation4 + $0x1], 1 }

</bundles_post_ra>
